<compile_context>
chip_gen: v7x
topology: tpu7x:2x2x1
jax: 0.10.0
libtpu: 0.0.40
codegen_flags: <defaults>
</compile_context>

<pallas_src>
import math

import jax
import jax.numpy as jnp
from jax import lax
from jax.experimental import pallas as pl
from jax.experimental.pallas import tpu as pltpu

# ----------------------- config (mirrors `opt`) -----------------------------
SEQ_LEN = 8                                # opt.seq_len (frames per window)
T = SEQ_LEN - 1                            # 7 real transitions per window
TPAD = 8                                   # padded to a full sublane tile
IMG_C, IMG_H, IMG_W = 3, 16, 16
FRAME_FEATS = IMG_C * IMG_H * IMG_W        # 768
SAMPLES_PER_INTERVAL = 10
IMU_FEATS = SAMPLES_PER_INTERVAL * 6       # 60
V_F_LEN = 24
I_F_LEN = 8
EMBED_DIM = V_F_LEN + I_F_LEN              # opt.embedding_dim = 32
NHEAD = 4                                  # opt.nhead
HEAD_DIM = EMBED_DIM // NHEAD              # 8
DIM_FF = 64                                # opt.dim_feedforward
NUM_LAYERS = 2                             # opt.num_layers
LN_EPS = 1e-5
OUT_PAD = 128                              # lane-dense output; real outputs in lanes 0..5


# ----------------------- fused Pallas kernel --------------------------------
def _fused_vio_kernel(
    img_ref, imu_ref,
    posb_ref, wvab_ref, wimu_ref,
    wqkvb_ref, wob_ref, lnp_ref, w1b_ref, w2b_ref,
    hw1b_ref, hw2b_ref,
    o_ref,
):
    """One batch window per grid step; everything resident in VMEM."""
    d = EMBED_DIM
    scale = 1.0 / math.sqrt(HEAD_DIM)

    def mm(a, b):
        return jnp.dot(a, b, preferred_element_type=jnp.float32)

    def layer_norm(v, g, b):
        mu = jnp.mean(v, axis=-1, keepdims=True)
        var = jnp.mean((v - mu) ** 2, axis=-1, keepdims=True)
        return (v - mu) * lax.rsqrt(var + LN_EPS) * g + b

    # ---- FlexibleEncoder (linear approximation), fused onto 32 lanes ----
    frames = img_ref[...]                              # (S=8, 768) bf16
    proj = mm(frames, wvab_ref[...])                   # (8, 64) f32; [pa | pb]
    pa = proj[:, :d]                                   # first frame of pair
    pb = proj[:, d:2 * d]                              # second frame of pair
    # row t needs pb[t+1]; row 7 is the dummy token (wraps, masked later)
    pb_next = jnp.concatenate([pb[1:], pb[:1]], axis=0)
    fi = mm(imu_ref[...], wimu_ref[...])               # (8, 32); dummy row is 0
    x = pa + pb_next + fi + posb_ref[...]              # (TPAD, 32)

    # key mask: the dummy token (index TPAD-1) is never attended to
    col = lax.broadcasted_iota(jnp.int32, (TPAD, TPAD), 1)
    mask_bias = jnp.where(col == TPAD - 1, -1e30, 0.0).astype(jnp.float32)

    # ---- Transformer encoder (post-norm, ReLU FFN, dropout = eval/off) ----
    for l in range(NUM_LAYERS):
        wqkvb = wqkvb_ref[l]                           # (33, 96): rows 0..31 W, row 32 bias
        qkv = mm(x, wqkvb[:d]) + wqkvb[d:d + 1]        # (TPAD, 96)
        ctx_heads = []
        for h in range(NHEAD):
            q_h = qkv[:, h * HEAD_DIM:(h + 1) * HEAD_DIM]
            k_h = qkv[:, d + h * HEAD_DIM:d + (h + 1) * HEAD_DIM]
            v_h = qkv[:, 2 * d + h * HEAD_DIM:2 * d + (h + 1) * HEAD_DIM]
            s = lax.dot_general(q_h, k_h, (((1,), (1,)), ((), ())),
                                preferred_element_type=jnp.float32) * scale
            s = s + mask_bias
            s = s - jnp.max(s, axis=-1, keepdims=True)
            e = jnp.exp(s)
            p = e * pl.reciprocal(jnp.sum(e, axis=-1, keepdims=True), approx=True)
            ctx_heads.append(mm(p, v_h))               # (TPAD, HEAD_DIM)
        ctx = jnp.concatenate(ctx_heads, axis=-1)      # (TPAD, 32)

        wob = wob_ref[l]                               # (33, 32)
        attn = mm(ctx, wob[:d]) + wob[d:d + 1]

        ln = lnp_ref[l]                                # (4, 32): g1, b1, g2, b2
        x = layer_norm(x + attn, ln[0:1], ln[1:2])

        w1b = w1b_ref[l]                               # (33, 64)
        w2b = w2b_ref[l]                               # (65, 32)
        h1 = jnp.maximum(mm(x, w1b[:d]) + w1b[d:d + 1], 0.0)
        ff = mm(h1, w2b[:DIM_FF]) + w2b[DIM_FF:DIM_FF + 1]
        x = layer_norm(x + ff, ln[2:3], ln[3:4])

    # ---- fc head: Linear(D,D) -> LeakyReLU(0.1) -> Linear(D,6) (padded) ----
    hw1b = hw1b_ref[...]                               # (33, 32)
    hw2b = hw2b_ref[...]                               # (33, 128)
    hh = mm(x, hw1b[:d]) + hw1b[d:d + 1]
    hh = jnp.where(hh > 0, hh, 0.1 * hh)
    o_ref[...] = mm(hh, hw2b[:d]) + hw2b[d:d + 1]      # (TPAD, 128), lane-dense


_W_ORDER = ("posb", "wvab", "wimu", "wqkvb", "wob", "lnp", "w1b", "w2b",
            "hw1b", "hw2b")


# ----------------------- wrapper ---------------------------------------------
def flexible_transformer_vio_forward(img, imu, params):
    b, s = img.shape[0], img.shape[1]
    t = s - 1
    img2d = img.reshape(b * s, FRAME_FEATS).astype(jnp.bfloat16)   # (B*S, 768)
    imu3 = imu.reshape(b, t, IMU_FEATS).astype(jnp.float32)
    imu2d = jnp.pad(imu3, ((0, 0), (0, TPAD - t), (0, 0))).reshape(
        b * TPAD, IMU_FEATS)                                       # (B*TPAD, 60)

    weights = [params[k] for k in _W_ORDER]
    weight_specs = [
        pl.BlockSpec(w.shape, lambda i, nd=w.ndim: (0,) * nd) for w in weights
    ]

    out = pl.pallas_call(
        _fused_vio_kernel,
        out_shape=jax.ShapeDtypeStruct((b * TPAD, OUT_PAD), jnp.float32),
        grid=(b,),
        in_specs=[
            pl.BlockSpec((s, FRAME_FEATS), lambda i: (i, 0)),
            pl.BlockSpec((TPAD, IMU_FEATS), lambda i: (i, 0)),
        ] + weight_specs,
        out_specs=pl.BlockSpec((TPAD, OUT_PAD), lambda i: (i, 0)),
        compiler_params=pltpu.CompilerParams(
            dimension_semantics=("parallel",),
        ),
    )(img2d, imu2d, *weights)

    return out.reshape(b, TPAD, OUT_PAD)[:, :t, :6]


def positional_embedding(seq_length, dim):
    pos = jnp.arange(seq_length, dtype=jnp.float32)[:, None]
    div = jnp.exp(jnp.arange(0, dim, 2, dtype=jnp.float32)
                  * (-math.log(10000.0) / dim))
    pe = jnp.zeros((seq_length, dim), jnp.float32)
    pe = pe.at[:, 0::2].set(jnp.sin(pos * div))
    pe = pe.at[:, 1::2].set(jnp.cos(pos * div))
    return pe


def init_params(key):
    d, ff, L = EMBED_DIM, DIM_FF, NUM_LAYERS
    keys = iter(jax.random.split(key, 16))

    def kaiming(shape, fan_in):
        return jax.random.normal(next(keys), shape, jnp.float32) * math.sqrt(2.0 / fan_in)

    p = {}
    # Encoder approximation: stacked-frame-pair visual projection, both halves
    # fused into one (768, 64) bf16 weight (visual cols 0..23 of each 32-lane
    # half, zero-padded elsewhere); inertial weight occupies lanes 24..31.
    kv_in = 2 * FRAME_FEATS
    wv_full = kaiming((kv_in, V_F_LEN), kv_in)
    pad_v = jnp.zeros((FRAME_FEATS, I_F_LEN), jnp.float32)
    wva = jnp.concatenate([wv_full[:FRAME_FEATS], pad_v], axis=1)   # (768, 32)
    wvb = jnp.concatenate([wv_full[FRAME_FEATS:], pad_v], axis=1)   # (768, 32)
    p["wvab"] = jnp.concatenate([wva, wvb], axis=1).astype(jnp.bfloat16)  # (768, 64)
    wi_full = kaiming((IMU_FEATS, I_F_LEN), IMU_FEATS)
    p["wimu"] = jnp.concatenate(
        [jnp.zeros((IMU_FEATS, V_F_LEN), jnp.float32), wi_full], axis=1)  # (60, 32)

    # Positional embedding (+ zero encoder bias folded in), padded to TPAD rows.
    p["posb"] = jnp.pad(positional_embedding(T, d), ((0, TPAD - T), (0, 0)))  # (8, 32)

    # Per-layer fused [Wq|Wk|Wv] with the bias packed as the last row.
    wqkv = kaiming((L, d, 3 * d), d)
    p["wqkvb"] = jnp.concatenate([wqkv, jnp.zeros((L, 1, 3 * d), jnp.float32)], axis=1)
    wo = kaiming((L, d, d), d)
    p["wob"] = jnp.concatenate([wo, jnp.zeros((L, 1, d), jnp.float32)], axis=1)
    # LayerNorm params packed per layer: rows [g1, b1, g2, b2].
    ln_one = jnp.concatenate([jnp.ones((1, d)), jnp.zeros((1, d)),
                              jnp.ones((1, d)), jnp.zeros((1, d))], axis=0)
    p["lnp"] = jnp.stack([ln_one] * L, axis=0).astype(jnp.float32)       # (L, 4, 32)
    w1 = kaiming((L, d, ff), d)
    p["w1b"] = jnp.concatenate([w1, jnp.zeros((L, 1, ff), jnp.float32)], axis=1)
    w2 = kaiming((L, ff, d), ff)
    p["w2b"] = jnp.concatenate([w2, jnp.zeros((L, 1, d), jnp.float32)], axis=1)

    # fc head; final layer padded to 128 output lanes for a lane-dense store.
    hw1 = kaiming((d, d), d)
    p["hw1b"] = jnp.concatenate([hw1, jnp.zeros((1, d), jnp.float32)], axis=0)  # (33, 32)
    hw2 = jnp.pad(kaiming((d, 6), d), ((0, 0), (0, OUT_PAD - 6)))
    p["hw2b"] = jnp.concatenate([hw2, jnp.zeros((1, OUT_PAD), jnp.float32)], axis=0)  # (33, 128)
    return p


if __name__ == "__main__":
    key = jax.random.PRNGKey(0)
    k_img, k_imu, k_par = jax.random.split(key, 3)

    B = 2
    img = jax.random.normal(k_img, (B, SEQ_LEN, IMG_C, IMG_H, IMG_W), jnp.float32)
    imu = jax.random.normal(
        k_imu, (B, (SEQ_LEN - 1) * SAMPLES_PER_INTERVAL, 6), jnp.float32)
    params = init_params(k_par)

    poses = flexible_transformer_vio_forward(img, imu, params)
    poses = jax.block_until_ready(poses)

    assert poses.shape == (B, SEQ_LEN - 1, 6), poses.shape
    assert bool(jnp.all(jnp.isfinite(poses)))
    print("KERNEL_OK")
</pallas_src>

<mosaic_0001>
module attributes {stable_mosaic.version = 11 : i64} {
  func.func @_fused_vio_kernel(%arg0: i32, %arg1: memref<8x768xbf16, #tpu.memory_space<vmem>>, %arg2: memref<8x60xf32, #tpu.memory_space<vmem>>, %arg3: memref<8x32xf32, #tpu.memory_space<vmem>>, %arg4: memref<768x64xbf16, #tpu.memory_space<vmem>>, %arg5: memref<60x32xf32, #tpu.memory_space<vmem>>, %arg6: memref<2x33x96xf32, #tpu.memory_space<vmem>>, %arg7: memref<2x33x32xf32, #tpu.memory_space<vmem>>, %arg8: memref<2x4x32xf32, #tpu.memory_space<vmem>>, %arg9: memref<2x33x64xf32, #tpu.memory_space<vmem>>, %arg10: memref<2x65x32xf32, #tpu.memory_space<vmem>>, %arg11: memref<33x32xf32, #tpu.memory_space<vmem>>, %arg12: memref<33x128xf32, #tpu.memory_space<vmem>>, %arg13: memref<8x128xf32, #tpu.memory_space<vmem>>) attributes {dimension_semantics = [#tpu.dimension_semantics<parallel>], iteration_bounds = array<i64: 2>, scalar_prefetch = 0 : i64, scratch_operands = 0 : i64, tpu.core_type = #tpu.core_type<tc>, window_params = [{transform_indices = @transform_0, window_bounds = array<i64: 8, 768>}, {transform_indices = @transform_1, window_bounds = array<i64: 8, 60>}, {pipeline_mode = #tpu.pipeline_mode<synchronous>, transform_indices = @transform_2, window_bounds = array<i64: 8, 32>}, {pipeline_mode = #tpu.pipeline_mode<synchronous>, transform_indices = @transform_3, window_bounds = array<i64: 768, 64>}, {pipeline_mode = #tpu.pipeline_mode<synchronous>, transform_indices = @transform_4, window_bounds = array<i64: 60, 32>}, {pipeline_mode = #tpu.pipeline_mode<synchronous>, transform_indices = @transform_5, window_bounds = array<i64: 2, 33, 96>}, {pipeline_mode = #tpu.pipeline_mode<synchronous>, transform_indices = @transform_6, window_bounds = array<i64: 2, 33, 32>}, {pipeline_mode = #tpu.pipeline_mode<synchronous>, transform_indices = @transform_7, window_bounds = array<i64: 2, 4, 32>}, {pipeline_mode = #tpu.pipeline_mode<synchronous>, transform_indices = @transform_8, window_bounds = array<i64: 2, 33, 64>}, {pipeline_mode = #tpu.pipeline_mode<synchronous>, transform_indices = @transform_9, window_bounds = array<i64: 2, 65, 32>}, {pipeline_mode = #tpu.pipeline_mode<synchronous>, transform_indices = @transform_10, window_bounds = array<i64: 33, 32>}, {pipeline_mode = #tpu.pipeline_mode<synchronous>, transform_indices = @transform_11, window_bounds = array<i64: 33, 128>}, {transform_indices = @transform_12, window_bounds = array<i64: 8, 128>}]} {
    %c0 = arith.constant 0 : index
    %c0_0 = arith.constant 0 : index
    %0 = vector.load %arg1[%c0, %c0_0] : memref<8x768xbf16, #tpu.memory_space<vmem>>, vector<8x768xbf16>
    %c0_1 = arith.constant 0 : index
    %c0_2 = arith.constant 0 : index
    %1 = vector.load %arg4[%c0_1, %c0_2] : memref<768x64xbf16, #tpu.memory_space<vmem>>, vector<768x64xbf16>
    %cst = arith.constant dense<0.000000e+00> : vector<8x64xf32>
    %2 = tpu.matmul %0, %1, %cst {dimension_numbers = #tpu.dot_dimension_numbers<[1], [0], [0], [1], [0, 0, 1, 1], [], []>} : vector<8x768xbf16>, vector<768x64xbf16>, vector<8x64xf32> -> vector<8x64xf32>
    %3 = vector.extract_strided_slice %2 {offsets = [0, 0], sizes = [8, 32], strides = [1, 1]} : vector<8x64xf32> to vector<8x32xf32>
    %4 = vector.extract_strided_slice %2 {offsets = [0, 32], sizes = [8, 32], strides = [1, 1]} : vector<8x64xf32> to vector<8x32xf32>
    %5 = vector.extract_strided_slice %4 {offsets = [1, 0], sizes = [7, 32], strides = [1, 1]} : vector<8x32xf32> to vector<7x32xf32>
    %6 = vector.extract_strided_slice %4 {offsets = [0, 0], sizes = [1, 32], strides = [1, 1]} : vector<8x32xf32> to vector<1x32xf32>
    %7 = tpu.concatenate %5, %6 in 0 : vector<7x32xf32>, vector<1x32xf32> -> vector<8x32xf32>
    %c0_3 = arith.constant 0 : index
    %c0_4 = arith.constant 0 : index
    %8 = vector.load %arg2[%c0_3, %c0_4] : memref<8x60xf32, #tpu.memory_space<vmem>>, vector<8x60xf32>
    %c0_5 = arith.constant 0 : index
    %c0_6 = arith.constant 0 : index
    %9 = vector.load %arg5[%c0_5, %c0_6] : memref<60x32xf32, #tpu.memory_space<vmem>>, vector<60x32xf32>
    %cst_7 = arith.constant dense<0.000000e+00> : vector<8x32xf32>
    %10 = tpu.matmul %8, %9, %cst_7 {dimension_numbers = #tpu.dot_dimension_numbers<[1], [0], [0], [1], [0, 0, 1, 1], [], []>} : vector<8x60xf32>, vector<60x32xf32>, vector<8x32xf32> -> vector<8x32xf32>
    %11 = arith.addf %3, %7 : vector<8x32xf32>
    %12 = arith.addf %11, %10 : vector<8x32xf32>
    %c0_8 = arith.constant 0 : index
    %c0_9 = arith.constant 0 : index
    %13 = vector.load %arg3[%c0_8, %c0_9] : memref<8x32xf32, #tpu.memory_space<vmem>>, vector<8x32xf32>
    %14 = arith.addf %12, %13 : vector<8x32xf32>
    %15 = tpu.iota {dimensions = array<i32: 1>} : vector<8x8xi32>
    %c7_i32 = arith.constant 7 : i32
    %16 = vector.broadcast %c7_i32 : i32 to vector<8x8xi32>
    %17 = arith.cmpi eq, %15, %16 : vector<8x8xi32>
    %cst_10 = arith.constant -1.000000e+30 : f32
    %cst_11 = arith.constant 0.000000e+00 : f32
    %18 = vector.broadcast %cst_10 : f32 to vector<8x8xf32>
    %19 = vector.broadcast %cst_11 : f32 to vector<8x8xf32>
    %20 = arith.select %17, %18, %19 : vector<8x8xi1>, vector<8x8xf32>
    %c0_12 = arith.constant 0 : index
    %c0_13 = arith.constant 0 : index
    %c0_14 = arith.constant 0 : index
    %21 = vector.load %arg6[%c0_12, %c0_13, %c0_14] : memref<2x33x96xf32, #tpu.memory_space<vmem>>, vector<1x33x96xf32>
    %22 = vector.shape_cast %21 : vector<1x33x96xf32> to vector<33x96xf32>
    %23 = vector.extract_strided_slice %22 {offsets = [0, 0], sizes = [32, 96], strides = [1, 1]} : vector<33x96xf32> to vector<32x96xf32>
    %cst_15 = arith.constant dense<0.000000e+00> : vector<8x96xf32>
    %24 = tpu.matmul %14, %23, %cst_15 {dimension_numbers = #tpu.dot_dimension_numbers<[1], [0], [0], [1], [0, 0, 1, 1], [], []>} : vector<8x32xf32>, vector<32x96xf32>, vector<8x96xf32> -> vector<8x96xf32>
    %25 = vector.extract_strided_slice %22 {offsets = [32, 0], sizes = [1, 96], strides = [1, 1]} : vector<33x96xf32> to vector<1x96xf32>
    %26 = vector.broadcast %25 : vector<1x96xf32> to vector<8x96xf32>
    %27 = arith.addf %24, %26 : vector<8x96xf32>
    %28 = vector.extract_strided_slice %27 {offsets = [0, 0], sizes = [8, 8], strides = [1, 1]} : vector<8x96xf32> to vector<8x8xf32>
    %29 = vector.extract_strided_slice %27 {offsets = [0, 32], sizes = [8, 8], strides = [1, 1]} : vector<8x96xf32> to vector<8x8xf32>
    %30 = vector.extract_strided_slice %27 {offsets = [0, 64], sizes = [8, 8], strides = [1, 1]} : vector<8x96xf32> to vector<8x8xf32>
    %cst_16 = arith.constant dense<0.000000e+00> : vector<8x8xf32>
    %31 = tpu.matmul %28, %29, %cst_16 {dimension_numbers = #tpu.dot_dimension_numbers<[1], [1], [0], [0], [0, 0, 1, 0], [], []>} : vector<8x8xf32>, vector<8x8xf32>, vector<8x8xf32> -> vector<8x8xf32>
    %cst_17 = arith.constant 0.353553385 : f32
    %32 = vector.broadcast %cst_17 : f32 to vector<8x8xf32>
    %33 = arith.mulf %31, %32 : vector<8x8xf32>
    %34 = arith.addf %33, %20 : vector<8x8xf32>
    %cst_18 = arith.constant dense<0xFF800000> : vector<8xf32>
    %35 = vector.multi_reduction <maximumf>, %34, %cst_18 [1] : vector<8x8xf32> to vector<8xf32>
    %36 = vector.shape_cast %35 : vector<8xf32> to vector<8x1xf32>
    %37 = vector.broadcast %36 : vector<8x1xf32> to vector<8x8xf32>
    %38 = arith.subf %34, %37 : vector<8x8xf32>
    %39 = math.exp %38 : vector<8x8xf32>
    %cst_19 = arith.constant dense<0.000000e+00> : vector<8xf32>
    %40 = vector.multi_reduction <add>, %39, %cst_19 [1] : vector<8x8xf32> to vector<8xf32>
    %41 = vector.shape_cast %40 : vector<8xf32> to vector<8x1xf32>
    %42 = tpu.reciprocal %41 {approx = true} : vector<8x1xf32> -> vector<8x1xf32>
    %43 = vector.broadcast %42 : vector<8x1xf32> to vector<8x8xf32>
    %44 = arith.mulf %39, %43 : vector<8x8xf32>
    %cst_20 = arith.constant dense<0.000000e+00> : vector<8x8xf32>
    %45 = tpu.matmul %44, %30, %cst_20 {dimension_numbers = #tpu.dot_dimension_numbers<[1], [0], [0], [1], [0, 0, 1, 1], [], []>} : vector<8x8xf32>, vector<8x8xf32>, vector<8x8xf32> -> vector<8x8xf32>
    %46 = vector.extract_strided_slice %27 {offsets = [0, 8], sizes = [8, 8], strides = [1, 1]} : vector<8x96xf32> to vector<8x8xf32>
    %47 = vector.extract_strided_slice %27 {offsets = [0, 40], sizes = [8, 8], strides = [1, 1]} : vector<8x96xf32> to vector<8x8xf32>
    %48 = vector.extract_strided_slice %27 {offsets = [0, 72], sizes = [8, 8], strides = [1, 1]} : vector<8x96xf32> to vector<8x8xf32>
    %cst_21 = arith.constant dense<0.000000e+00> : vector<8x8xf32>
    %49 = tpu.matmul %46, %47, %cst_21 {dimension_numbers = #tpu.dot_dimension_numbers<[1], [1], [0], [0], [0, 0, 1, 0], [], []>} : vector<8x8xf32>, vector<8x8xf32>, vector<8x8xf32> -> vector<8x8xf32>
    %cst_22 = arith.constant 0.353553385 : f32
    %50 = vector.broadcast %cst_22 : f32 to vector<8x8xf32>
    %51 = arith.mulf %49, %50 : vector<8x8xf32>
    %52 = arith.addf %51, %20 : vector<8x8xf32>
    %cst_23 = arith.constant dense<0xFF800000> : vector<8xf32>
    %53 = vector.multi_reduction <maximumf>, %52, %cst_23 [1] : vector<8x8xf32> to vector<8xf32>
    %54 = vector.shape_cast %53 : vector<8xf32> to vector<8x1xf32>
    %55 = vector.broadcast %54 : vector<8x1xf32> to vector<8x8xf32>
    %56 = arith.subf %52, %55 : vector<8x8xf32>
    %57 = math.exp %56 : vector<8x8xf32>
    %cst_24 = arith.constant dense<0.000000e+00> : vector<8xf32>
    %58 = vector.multi_reduction <add>, %57, %cst_24 [1] : vector<8x8xf32> to vector<8xf32>
    %59 = vector.shape_cast %58 : vector<8xf32> to vector<8x1xf32>
    %60 = tpu.reciprocal %59 {approx = true} : vector<8x1xf32> -> vector<8x1xf32>
    %61 = vector.broadcast %60 : vector<8x1xf32> to vector<8x8xf32>
    %62 = arith.mulf %57, %61 : vector<8x8xf32>
    %cst_25 = arith.constant dense<0.000000e+00> : vector<8x8xf32>
    %63 = tpu.matmul %62, %48, %cst_25 {dimension_numbers = #tpu.dot_dimension_numbers<[1], [0], [0], [1], [0, 0, 1, 1], [], []>} : vector<8x8xf32>, vector<8x8xf32>, vector<8x8xf32> -> vector<8x8xf32>
    %64 = vector.extract_strided_slice %27 {offsets = [0, 16], sizes = [8, 8], strides = [1, 1]} : vector<8x96xf32> to vector<8x8xf32>
    %65 = vector.extract_strided_slice %27 {offsets = [0, 48], sizes = [8, 8], strides = [1, 1]} : vector<8x96xf32> to vector<8x8xf32>
    %66 = vector.extract_strided_slice %27 {offsets = [0, 80], sizes = [8, 8], strides = [1, 1]} : vector<8x96xf32> to vector<8x8xf32>
    %cst_26 = arith.constant dense<0.000000e+00> : vector<8x8xf32>
    %67 = tpu.matmul %64, %65, %cst_26 {dimension_numbers = #tpu.dot_dimension_numbers<[1], [1], [0], [0], [0, 0, 1, 0], [], []>} : vector<8x8xf32>, vector<8x8xf32>, vector<8x8xf32> -> vector<8x8xf32>
    %cst_27 = arith.constant 0.353553385 : f32
    %68 = vector.broadcast %cst_27 : f32 to vector<8x8xf32>
    %69 = arith.mulf %67, %68 : vector<8x8xf32>
    %70 = arith.addf %69, %20 : vector<8x8xf32>
    %cst_28 = arith.constant dense<0xFF800000> : vector<8xf32>
    %71 = vector.multi_reduction <maximumf>, %70, %cst_28 [1] : vector<8x8xf32> to vector<8xf32>
    %72 = vector.shape_cast %71 : vector<8xf32> to vector<8x1xf32>
    %73 = vector.broadcast %72 : vector<8x1xf32> to vector<8x8xf32>
    %74 = arith.subf %70, %73 : vector<8x8xf32>
    %75 = math.exp %74 : vector<8x8xf32>
    %cst_29 = arith.constant dense<0.000000e+00> : vector<8xf32>
    %76 = vector.multi_reduction <add>, %75, %cst_29 [1] : vector<8x8xf32> to vector<8xf32>
    %77 = vector.shape_cast %76 : vector<8xf32> to vector<8x1xf32>
    %78 = tpu.reciprocal %77 {approx = true} : vector<8x1xf32> -> vector<8x1xf32>
    %79 = vector.broadcast %78 : vector<8x1xf32> to vector<8x8xf32>
    %80 = arith.mulf %75, %79 : vector<8x8xf32>
    %cst_30 = arith.constant dense<0.000000e+00> : vector<8x8xf32>
    %81 = tpu.matmul %80, %66, %cst_30 {dimension_numbers = #tpu.dot_dimension_numbers<[1], [0], [0], [1], [0, 0, 1, 1], [], []>} : vector<8x8xf32>, vector<8x8xf32>, vector<8x8xf32> -> vector<8x8xf32>
    %82 = vector.extract_strided_slice %27 {offsets = [0, 24], sizes = [8, 8], strides = [1, 1]} : vector<8x96xf32> to vector<8x8xf32>
    %83 = vector.extract_strided_slice %27 {offsets = [0, 56], sizes = [8, 8], strides = [1, 1]} : vector<8x96xf32> to vector<8x8xf32>
    %84 = vector.extract_strided_slice %27 {offsets = [0, 88], sizes = [8, 8], strides = [1, 1]} : vector<8x96xf32> to vector<8x8xf32>
    %cst_31 = arith.constant dense<0.000000e+00> : vector<8x8xf32>
    %85 = tpu.matmul %82, %83, %cst_31 {dimension_numbers = #tpu.dot_dimension_numbers<[1], [1], [0], [0], [0, 0, 1, 0], [], []>} : vector<8x8xf32>, vector<8x8xf32>, vector<8x8xf32> -> vector<8x8xf32>
    %cst_32 = arith.constant 0.353553385 : f32
    %86 = vector.broadcast %cst_32 : f32 to vector<8x8xf32>
    %87 = arith.mulf %85, %86 : vector<8x8xf32>
    %88 = arith.addf %87, %20 : vector<8x8xf32>
    %cst_33 = arith.constant dense<0xFF800000> : vector<8xf32>
    %89 = vector.multi_reduction <maximumf>, %88, %cst_33 [1] : vector<8x8xf32> to vector<8xf32>
    %90 = vector.shape_cast %89 : vector<8xf32> to vector<8x1xf32>
    %91 = vector.broadcast %90 : vector<8x1xf32> to vector<8x8xf32>
    %92 = arith.subf %88, %91 : vector<8x8xf32>
    %93 = math.exp %92 : vector<8x8xf32>
    %cst_34 = arith.constant dense<0.000000e+00> : vector<8xf32>
    %94 = vector.multi_reduction <add>, %93, %cst_34 [1] : vector<8x8xf32> to vector<8xf32>
    %95 = vector.shape_cast %94 : vector<8xf32> to vector<8x1xf32>
    %96 = tpu.reciprocal %95 {approx = true} : vector<8x1xf32> -> vector<8x1xf32>
    %97 = vector.broadcast %96 : vector<8x1xf32> to vector<8x8xf32>
    %98 = arith.mulf %93, %97 : vector<8x8xf32>
    %cst_35 = arith.constant dense<0.000000e+00> : vector<8x8xf32>
    %99 = tpu.matmul %98, %84, %cst_35 {dimension_numbers = #tpu.dot_dimension_numbers<[1], [0], [0], [1], [0, 0, 1, 1], [], []>} : vector<8x8xf32>, vector<8x8xf32>, vector<8x8xf32> -> vector<8x8xf32>
    %100 = tpu.concatenate %45, %63, %81, %99 in 1 : vector<8x8xf32>, vector<8x8xf32>, vector<8x8xf32>, vector<8x8xf32> -> vector<8x32xf32>
    %c0_36 = arith.constant 0 : index
    %c0_37 = arith.constant 0 : index
    %c0_38 = arith.constant 0 : index
    %101 = vector.load %arg7[%c0_36, %c0_37, %c0_38] : memref<2x33x32xf32, #tpu.memory_space<vmem>>, vector<1x33x32xf32>
    %102 = vector.shape_cast %101 : vector<1x33x32xf32> to vector<33x32xf32>
    %103 = vector.extract_strided_slice %102 {offsets = [0, 0], sizes = [32, 32], strides = [1, 1]} : vector<33x32xf32> to vector<32x32xf32>
    %cst_39 = arith.constant dense<0.000000e+00> : vector<8x32xf32>
    %104 = tpu.matmul %100, %103, %cst_39 {dimension_numbers = #tpu.dot_dimension_numbers<[1], [0], [0], [1], [0, 0, 1, 1], [], []>} : vector<8x32xf32>, vector<32x32xf32>, vector<8x32xf32> -> vector<8x32xf32>
    %105 = vector.extract_strided_slice %102 {offsets = [32, 0], sizes = [1, 32], strides = [1, 1]} : vector<33x32xf32> to vector<1x32xf32>
    %106 = vector.broadcast %105 : vector<1x32xf32> to vector<8x32xf32>
    %107 = arith.addf %104, %106 : vector<8x32xf32>
    %c0_40 = arith.constant 0 : index
    %c0_41 = arith.constant 0 : index
    %c0_42 = arith.constant 0 : index
    %108 = vector.load %arg8[%c0_40, %c0_41, %c0_42] : memref<2x4x32xf32, #tpu.memory_space<vmem>>, vector<1x4x32xf32>
    %109 = vector.shape_cast %108 : vector<1x4x32xf32> to vector<4x32xf32>
    %110 = arith.addf %14, %107 : vector<8x32xf32>
    %111 = vector.extract_strided_slice %109 {offsets = [0, 0], sizes = [1, 32], strides = [1, 1]} : vector<4x32xf32> to vector<1x32xf32>
    %112 = vector.extract_strided_slice %109 {offsets = [1, 0], sizes = [1, 32], strides = [1, 1]} : vector<4x32xf32> to vector<1x32xf32>
    %cst_43 = arith.constant dense<0.000000e+00> : vector<8xf32>
    %113 = vector.multi_reduction <add>, %110, %cst_43 [1] : vector<8x32xf32> to vector<8xf32>
    %114 = vector.shape_cast %113 : vector<8xf32> to vector<8x1xf32>
    %cst_44 = arith.constant 3.200000e+01 : f32
    %115 = vector.broadcast %cst_44 : f32 to vector<8x1xf32>
    %116 = arith.divf %114, %115 : vector<8x1xf32>
    %117 = vector.broadcast %116 : vector<8x1xf32> to vector<8x32xf32>
    %118 = arith.subf %110, %117 : vector<8x32xf32>
    %119 = arith.mulf %118, %118 : vector<8x32xf32>
    %cst_45 = arith.constant dense<0.000000e+00> : vector<8xf32>
    %120 = vector.multi_reduction <add>, %119, %cst_45 [1] : vector<8x32xf32> to vector<8xf32>
    %121 = vector.shape_cast %120 : vector<8xf32> to vector<8x1xf32>
    %cst_46 = arith.constant 3.200000e+01 : f32
    %122 = vector.broadcast %cst_46 : f32 to vector<8x1xf32>
    %123 = arith.divf %121, %122 : vector<8x1xf32>
    %124 = vector.broadcast %116 : vector<8x1xf32> to vector<8x32xf32>
    %125 = arith.subf %110, %124 : vector<8x32xf32>
    %cst_47 = arith.constant 9.99999974E-6 : f32
    %126 = vector.broadcast %cst_47 : f32 to vector<8x1xf32>
    %127 = arith.addf %123, %126 : vector<8x1xf32>
    %128 = math.rsqrt %127 : vector<8x1xf32>
    %129 = vector.broadcast %128 : vector<8x1xf32> to vector<8x32xf32>
    %130 = arith.mulf %125, %129 : vector<8x32xf32>
    %131 = vector.broadcast %111 : vector<1x32xf32> to vector<8x32xf32>
    %132 = arith.mulf %130, %131 : vector<8x32xf32>
    %133 = vector.broadcast %112 : vector<1x32xf32> to vector<8x32xf32>
    %134 = arith.addf %132, %133 : vector<8x32xf32>
    %c0_48 = arith.constant 0 : index
    %c0_49 = arith.constant 0 : index
    %c0_50 = arith.constant 0 : index
    %135 = vector.load %arg9[%c0_48, %c0_49, %c0_50] : memref<2x33x64xf32, #tpu.memory_space<vmem>>, vector<1x33x64xf32>
    %136 = vector.shape_cast %135 : vector<1x33x64xf32> to vector<33x64xf32>
    %c0_51 = arith.constant 0 : index
    %c0_52 = arith.constant 0 : index
    %c0_53 = arith.constant 0 : index
    %137 = vector.load %arg10[%c0_51, %c0_52, %c0_53] : memref<2x65x32xf32, #tpu.memory_space<vmem>>, vector<1x65x32xf32>
    %138 = vector.shape_cast %137 : vector<1x65x32xf32> to vector<65x32xf32>
    %139 = vector.extract_strided_slice %136 {offsets = [0, 0], sizes = [32, 64], strides = [1, 1]} : vector<33x64xf32> to vector<32x64xf32>
    %cst_54 = arith.constant dense<0.000000e+00> : vector<8x64xf32>
    %140 = tpu.matmul %134, %139, %cst_54 {dimension_numbers = #tpu.dot_dimension_numbers<[1], [0], [0], [1], [0, 0, 1, 1], [], []>} : vector<8x32xf32>, vector<32x64xf32>, vector<8x64xf32> -> vector<8x64xf32>
    %141 = vector.extract_strided_slice %136 {offsets = [32, 0], sizes = [1, 64], strides = [1, 1]} : vector<33x64xf32> to vector<1x64xf32>
    %142 = vector.broadcast %141 : vector<1x64xf32> to vector<8x64xf32>
    %143 = arith.addf %140, %142 : vector<8x64xf32>
    %cst_55 = arith.constant 0.000000e+00 : f32
    %144 = vector.broadcast %cst_55 : f32 to vector<8x64xf32>
    %145 = arith.maximumf %143, %144 : vector<8x64xf32>
    %146 = vector.extract_strided_slice %138 {offsets = [0, 0], sizes = [64, 32], strides = [1, 1]} : vector<65x32xf32> to vector<64x32xf32>
    %cst_56 = arith.constant dense<0.000000e+00> : vector<8x32xf32>
    %147 = tpu.matmul %145, %146, %cst_56 {dimension_numbers = #tpu.dot_dimension_numbers<[1], [0], [0], [1], [0, 0, 1, 1], [], []>} : vector<8x64xf32>, vector<64x32xf32>, vector<8x32xf32> -> vector<8x32xf32>
    %148 = vector.extract_strided_slice %138 {offsets = [64, 0], sizes = [1, 32], strides = [1, 1]} : vector<65x32xf32> to vector<1x32xf32>
    %149 = vector.broadcast %148 : vector<1x32xf32> to vector<8x32xf32>
    %150 = arith.addf %147, %149 : vector<8x32xf32>
    %151 = arith.addf %134, %150 : vector<8x32xf32>
    %152 = vector.extract_strided_slice %109 {offsets = [2, 0], sizes = [1, 32], strides = [1, 1]} : vector<4x32xf32> to vector<1x32xf32>
    %153 = vector.extract_strided_slice %109 {offsets = [3, 0], sizes = [1, 32], strides = [1, 1]} : vector<4x32xf32> to vector<1x32xf32>
    %cst_57 = arith.constant dense<0.000000e+00> : vector<8xf32>
    %154 = vector.multi_reduction <add>, %151, %cst_57 [1] : vector<8x32xf32> to vector<8xf32>
    %155 = vector.shape_cast %154 : vector<8xf32> to vector<8x1xf32>
    %cst_58 = arith.constant 3.200000e+01 : f32
    %156 = vector.broadcast %cst_58 : f32 to vector<8x1xf32>
    %157 = arith.divf %155, %156 : vector<8x1xf32>
    %158 = vector.broadcast %157 : vector<8x1xf32> to vector<8x32xf32>
    %159 = arith.subf %151, %158 : vector<8x32xf32>
    %160 = arith.mulf %159, %159 : vector<8x32xf32>
    %cst_59 = arith.constant dense<0.000000e+00> : vector<8xf32>
    %161 = vector.multi_reduction <add>, %160, %cst_59 [1] : vector<8x32xf32> to vector<8xf32>
    %162 = vector.shape_cast %161 : vector<8xf32> to vector<8x1xf32>
    %cst_60 = arith.constant 3.200000e+01 : f32
    %163 = vector.broadcast %cst_60 : f32 to vector<8x1xf32>
    %164 = arith.divf %162, %163 : vector<8x1xf32>
    %165 = vector.broadcast %157 : vector<8x1xf32> to vector<8x32xf32>
    %166 = arith.subf %151, %165 : vector<8x32xf32>
    %cst_61 = arith.constant 9.99999974E-6 : f32
    %167 = vector.broadcast %cst_61 : f32 to vector<8x1xf32>
    %168 = arith.addf %164, %167 : vector<8x1xf32>
    %169 = math.rsqrt %168 : vector<8x1xf32>
    %170 = vector.broadcast %169 : vector<8x1xf32> to vector<8x32xf32>
    %171 = arith.mulf %166, %170 : vector<8x32xf32>
    %172 = vector.broadcast %152 : vector<1x32xf32> to vector<8x32xf32>
    %173 = arith.mulf %171, %172 : vector<8x32xf32>
    %174 = vector.broadcast %153 : vector<1x32xf32> to vector<8x32xf32>
    %175 = arith.addf %173, %174 : vector<8x32xf32>
    %c1 = arith.constant 1 : index
    %c0_62 = arith.constant 0 : index
    %c0_63 = arith.constant 0 : index
    %176 = vector.load %arg6[%c1, %c0_62, %c0_63] : memref<2x33x96xf32, #tpu.memory_space<vmem>>, vector<1x33x96xf32>
    %177 = vector.shape_cast %176 : vector<1x33x96xf32> to vector<33x96xf32>
    %178 = vector.extract_strided_slice %177 {offsets = [0, 0], sizes = [32, 96], strides = [1, 1]} : vector<33x96xf32> to vector<32x96xf32>
    %cst_64 = arith.constant dense<0.000000e+00> : vector<8x96xf32>
    %179 = tpu.matmul %175, %178, %cst_64 {dimension_numbers = #tpu.dot_dimension_numbers<[1], [0], [0], [1], [0, 0, 1, 1], [], []>} : vector<8x32xf32>, vector<32x96xf32>, vector<8x96xf32> -> vector<8x96xf32>
    %180 = vector.extract_strided_slice %177 {offsets = [32, 0], sizes = [1, 96], strides = [1, 1]} : vector<33x96xf32> to vector<1x96xf32>
    %181 = vector.broadcast %180 : vector<1x96xf32> to vector<8x96xf32>
    %182 = arith.addf %179, %181 : vector<8x96xf32>
    %183 = vector.extract_strided_slice %182 {offsets = [0, 0], sizes = [8, 8], strides = [1, 1]} : vector<8x96xf32> to vector<8x8xf32>
    %184 = vector.extract_strided_slice %182 {offsets = [0, 32], sizes = [8, 8], strides = [1, 1]} : vector<8x96xf32> to vector<8x8xf32>
    %185 = vector.extract_strided_slice %182 {offsets = [0, 64], sizes = [8, 8], strides = [1, 1]} : vector<8x96xf32> to vector<8x8xf32>
    %cst_65 = arith.constant dense<0.000000e+00> : vector<8x8xf32>
    %186 = tpu.matmul %183, %184, %cst_65 {dimension_numbers = #tpu.dot_dimension_numbers<[1], [1], [0], [0], [0, 0, 1, 0], [], []>} : vector<8x8xf32>, vector<8x8xf32>, vector<8x8xf32> -> vector<8x8xf32>
    %cst_66 = arith.constant 0.353553385 : f32
    %187 = vector.broadcast %cst_66 : f32 to vector<8x8xf32>
    %188 = arith.mulf %186, %187 : vector<8x8xf32>
    %189 = arith.addf %188, %20 : vector<8x8xf32>
    %cst_67 = arith.constant dense<0xFF800000> : vector<8xf32>
    %190 = vector.multi_reduction <maximumf>, %189, %cst_67 [1] : vector<8x8xf32> to vector<8xf32>
    %191 = vector.shape_cast %190 : vector<8xf32> to vector<8x1xf32>
    %192 = vector.broadcast %191 : vector<8x1xf32> to vector<8x8xf32>
    %193 = arith.subf %189, %192 : vector<8x8xf32>
    %194 = math.exp %193 : vector<8x8xf32>
    %cst_68 = arith.constant dense<0.000000e+00> : vector<8xf32>
    %195 = vector.multi_reduction <add>, %194, %cst_68 [1] : vector<8x8xf32> to vector<8xf32>
    %196 = vector.shape_cast %195 : vector<8xf32> to vector<8x1xf32>
    %197 = tpu.reciprocal %196 {approx = true} : vector<8x1xf32> -> vector<8x1xf32>
    %198 = vector.broadcast %197 : vector<8x1xf32> to vector<8x8xf32>
    %199 = arith.mulf %194, %198 : vector<8x8xf32>
    %cst_69 = arith.constant dense<0.000000e+00> : vector<8x8xf32>
    %200 = tpu.matmul %199, %185, %cst_69 {dimension_numbers = #tpu.dot_dimension_numbers<[1], [0], [0], [1], [0, 0, 1, 1], [], []>} : vector<8x8xf32>, vector<8x8xf32>, vector<8x8xf32> -> vector<8x8xf32>
    %201 = vector.extract_strided_slice %182 {offsets = [0, 8], sizes = [8, 8], strides = [1, 1]} : vector<8x96xf32> to vector<8x8xf32>
    %202 = vector.extract_strided_slice %182 {offsets = [0, 40], sizes = [8, 8], strides = [1, 1]} : vector<8x96xf32> to vector<8x8xf32>
    %203 = vector.extract_strided_slice %182 {offsets = [0, 72], sizes = [8, 8], strides = [1, 1]} : vector<8x96xf32> to vector<8x8xf32>
    %cst_70 = arith.constant dense<0.000000e+00> : vector<8x8xf32>
    %204 = tpu.matmul %201, %202, %cst_70 {dimension_numbers = #tpu.dot_dimension_numbers<[1], [1], [0], [0], [0, 0, 1, 0], [], []>} : vector<8x8xf32>, vector<8x8xf32>, vector<8x8xf32> -> vector<8x8xf32>
    %cst_71 = arith.constant 0.353553385 : f32
    %205 = vector.broadcast %cst_71 : f32 to vector<8x8xf32>
    %206 = arith.mulf %204, %205 : vector<8x8xf32>
    %207 = arith.addf %206, %20 : vector<8x8xf32>
    %cst_72 = arith.constant dense<0xFF800000> : vector<8xf32>
    %208 = vector.multi_reduction <maximumf>, %207, %cst_72 [1] : vector<8x8xf32> to vector<8xf32>
    %209 = vector.shape_cast %208 : vector<8xf32> to vector<8x1xf32>
    %210 = vector.broadcast %209 : vector<8x1xf32> to vector<8x8xf32>
    %211 = arith.subf %207, %210 : vector<8x8xf32>
    %212 = math.exp %211 : vector<8x8xf32>
    %cst_73 = arith.constant dense<0.000000e+00> : vector<8xf32>
    %213 = vector.multi_reduction <add>, %212, %cst_73 [1] : vector<8x8xf32> to vector<8xf32>
    %214 = vector.shape_cast %213 : vector<8xf32> to vector<8x1xf32>
    %215 = tpu.reciprocal %214 {approx = true} : vector<8x1xf32> -> vector<8x1xf32>
    %216 = vector.broadcast %215 : vector<8x1xf32> to vector<8x8xf32>
    %217 = arith.mulf %212, %216 : vector<8x8xf32>
    %cst_74 = arith.constant dense<0.000000e+00> : vector<8x8xf32>
    %218 = tpu.matmul %217, %203, %cst_74 {dimension_numbers = #tpu.dot_dimension_numbers<[1], [0], [0], [1], [0, 0, 1, 1], [], []>} : vector<8x8xf32>, vector<8x8xf32>, vector<8x8xf32> -> vector<8x8xf32>
    %219 = vector.extract_strided_slice %182 {offsets = [0, 16], sizes = [8, 8], strides = [1, 1]} : vector<8x96xf32> to vector<8x8xf32>
    %220 = vector.extract_strided_slice %182 {offsets = [0, 48], sizes = [8, 8], strides = [1, 1]} : vector<8x96xf32> to vector<8x8xf32>
    %221 = vector.extract_strided_slice %182 {offsets = [0, 80], sizes = [8, 8], strides = [1, 1]} : vector<8x96xf32> to vector<8x8xf32>
    %cst_75 = arith.constant dense<0.000000e+00> : vector<8x8xf32>
    %222 = tpu.matmul %219, %220, %cst_75 {dimension_numbers = #tpu.dot_dimension_numbers<[1], [1], [0], [0], [0, 0, 1, 0], [], []>} : vector<8x8xf32>, vector<8x8xf32>, vector<8x8xf32> -> vector<8x8xf32>
    %cst_76 = arith.constant 0.353553385 : f32
    %223 = vector.broadcast %cst_76 : f32 to vector<8x8xf32>
    %224 = arith.mulf %222, %223 : vector<8x8xf32>
    %225 = arith.addf %224, %20 : vector<8x8xf32>
    %cst_77 = arith.constant dense<0xFF800000> : vector<8xf32>
    %226 = vector.multi_reduction <maximumf>, %225, %cst_77 [1] : vector<8x8xf32> to vector<8xf32>
    %227 = vector.shape_cast %226 : vector<8xf32> to vector<8x1xf32>
    %228 = vector.broadcast %227 : vector<8x1xf32> to vector<8x8xf32>
    %229 = arith.subf %225, %228 : vector<8x8xf32>
    %230 = math.exp %229 : vector<8x8xf32>
    %cst_78 = arith.constant dense<0.000000e+00> : vector<8xf32>
    %231 = vector.multi_reduction <add>, %230, %cst_78 [1] : vector<8x8xf32> to vector<8xf32>
    %232 = vector.shape_cast %231 : vector<8xf32> to vector<8x1xf32>
    %233 = tpu.reciprocal %232 {approx = true} : vector<8x1xf32> -> vector<8x1xf32>
    %234 = vector.broadcast %233 : vector<8x1xf32> to vector<8x8xf32>
    %235 = arith.mulf %230, %234 : vector<8x8xf32>
    %cst_79 = arith.constant dense<0.000000e+00> : vector<8x8xf32>
    %236 = tpu.matmul %235, %221, %cst_79 {dimension_numbers = #tpu.dot_dimension_numbers<[1], [0], [0], [1], [0, 0, 1, 1], [], []>} : vector<8x8xf32>, vector<8x8xf32>, vector<8x8xf32> -> vector<8x8xf32>
    %237 = vector.extract_strided_slice %182 {offsets = [0, 24], sizes = [8, 8], strides = [1, 1]} : vector<8x96xf32> to vector<8x8xf32>
    %238 = vector.extract_strided_slice %182 {offsets = [0, 56], sizes = [8, 8], strides = [1, 1]} : vector<8x96xf32> to vector<8x8xf32>
    %239 = vector.extract_strided_slice %182 {offsets = [0, 88], sizes = [8, 8], strides = [1, 1]} : vector<8x96xf32> to vector<8x8xf32>
    %cst_80 = arith.constant dense<0.000000e+00> : vector<8x8xf32>
    %240 = tpu.matmul %237, %238, %cst_80 {dimension_numbers = #tpu.dot_dimension_numbers<[1], [1], [0], [0], [0, 0, 1, 0], [], []>} : vector<8x8xf32>, vector<8x8xf32>, vector<8x8xf32> -> vector<8x8xf32>
    %cst_81 = arith.constant 0.353553385 : f32
    %241 = vector.broadcast %cst_81 : f32 to vector<8x8xf32>
    %242 = arith.mulf %240, %241 : vector<8x8xf32>
    %243 = arith.addf %242, %20 : vector<8x8xf32>
    %cst_82 = arith.constant dense<0xFF800000> : vector<8xf32>
    %244 = vector.multi_reduction <maximumf>, %243, %cst_82 [1] : vector<8x8xf32> to vector<8xf32>
    %245 = vector.shape_cast %244 : vector<8xf32> to vector<8x1xf32>
    %246 = vector.broadcast %245 : vector<8x1xf32> to vector<8x8xf32>
    %247 = arith.subf %243, %246 : vector<8x8xf32>
    %248 = math.exp %247 : vector<8x8xf32>
    %cst_83 = arith.constant dense<0.000000e+00> : vector<8xf32>
    %249 = vector.multi_reduction <add>, %248, %cst_83 [1] : vector<8x8xf32> to vector<8xf32>
    %250 = vector.shape_cast %249 : vector<8xf32> to vector<8x1xf32>
    %251 = tpu.reciprocal %250 {approx = true} : vector<8x1xf32> -> vector<8x1xf32>
    %252 = vector.broadcast %251 : vector<8x1xf32> to vector<8x8xf32>
    %253 = arith.mulf %248, %252 : vector<8x8xf32>
    %cst_84 = arith.constant dense<0.000000e+00> : vector<8x8xf32>
    %254 = tpu.matmul %253, %239, %cst_84 {dimension_numbers = #tpu.dot_dimension_numbers<[1], [0], [0], [1], [0, 0, 1, 1], [], []>} : vector<8x8xf32>, vector<8x8xf32>, vector<8x8xf32> -> vector<8x8xf32>
    %255 = tpu.concatenate %200, %218, %236, %254 in 1 : vector<8x8xf32>, vector<8x8xf32>, vector<8x8xf32>, vector<8x8xf32> -> vector<8x32xf32>
    %c1_85 = arith.constant 1 : index
    %c0_86 = arith.constant 0 : index
    %c0_87 = arith.constant 0 : index
    %256 = vector.load %arg7[%c1_85, %c0_86, %c0_87] : memref<2x33x32xf32, #tpu.memory_space<vmem>>, vector<1x33x32xf32>
    %257 = vector.shape_cast %256 : vector<1x33x32xf32> to vector<33x32xf32>
    %258 = vector.extract_strided_slice %257 {offsets = [0, 0], sizes = [32, 32], strides = [1, 1]} : vector<33x32xf32> to vector<32x32xf32>
    %cst_88 = arith.constant dense<0.000000e+00> : vector<8x32xf32>
    %259 = tpu.matmul %255, %258, %cst_88 {dimension_numbers = #tpu.dot_dimension_numbers<[1], [0], [0], [1], [0, 0, 1, 1], [], []>} : vector<8x32xf32>, vector<32x32xf32>, vector<8x32xf32> -> vector<8x32xf32>
    %260 = vector.extract_strided_slice %257 {offsets = [32, 0], sizes = [1, 32], strides = [1, 1]} : vector<33x32xf32> to vector<1x32xf32>
    %261 = vector.broadcast %260 : vector<1x32xf32> to vector<8x32xf32>
    %262 = arith.addf %259, %261 : vector<8x32xf32>
    %c1_89 = arith.constant 1 : index
    %c0_90 = arith.constant 0 : index
    %c0_91 = arith.constant 0 : index
    %263 = vector.load %arg8[%c1_89, %c0_90, %c0_91] : memref<2x4x32xf32, #tpu.memory_space<vmem>>, vector<1x4x32xf32>
    %264 = vector.shape_cast %263 : vector<1x4x32xf32> to vector<4x32xf32>
    %265 = arith.addf %175, %262 : vector<8x32xf32>
    %266 = vector.extract_strided_slice %264 {offsets = [0, 0], sizes = [1, 32], strides = [1, 1]} : vector<4x32xf32> to vector<1x32xf32>
    %267 = vector.extract_strided_slice %264 {offsets = [1, 0], sizes = [1, 32], strides = [1, 1]} : vector<4x32xf32> to vector<1x32xf32>
    %cst_92 = arith.constant dense<0.000000e+00> : vector<8xf32>
    %268 = vector.multi_reduction <add>, %265, %cst_92 [1] : vector<8x32xf32> to vector<8xf32>
    %269 = vector.shape_cast %268 : vector<8xf32> to vector<8x1xf32>
    %cst_93 = arith.constant 3.200000e+01 : f32
    %270 = vector.broadcast %cst_93 : f32 to vector<8x1xf32>
    %271 = arith.divf %269, %270 : vector<8x1xf32>
    %272 = vector.broadcast %271 : vector<8x1xf32> to vector<8x32xf32>
    %273 = arith.subf %265, %272 : vector<8x32xf32>
    %274 = arith.mulf %273, %273 : vector<8x32xf32>
    %cst_94 = arith.constant dense<0.000000e+00> : vector<8xf32>
    %275 = vector.multi_reduction <add>, %274, %cst_94 [1] : vector<8x32xf32> to vector<8xf32>
    %276 = vector.shape_cast %275 : vector<8xf32> to vector<8x1xf32>
    %cst_95 = arith.constant 3.200000e+01 : f32
    %277 = vector.broadcast %cst_95 : f32 to vector<8x1xf32>
    %278 = arith.divf %276, %277 : vector<8x1xf32>
    %279 = vector.broadcast %271 : vector<8x1xf32> to vector<8x32xf32>
    %280 = arith.subf %265, %279 : vector<8x32xf32>
    %cst_96 = arith.constant 9.99999974E-6 : f32
    %281 = vector.broadcast %cst_96 : f32 to vector<8x1xf32>
    %282 = arith.addf %278, %281 : vector<8x1xf32>
    %283 = math.rsqrt %282 : vector<8x1xf32>
    %284 = vector.broadcast %283 : vector<8x1xf32> to vector<8x32xf32>
    %285 = arith.mulf %280, %284 : vector<8x32xf32>
    %286 = vector.broadcast %266 : vector<1x32xf32> to vector<8x32xf32>
    %287 = arith.mulf %285, %286 : vector<8x32xf32>
    %288 = vector.broadcast %267 : vector<1x32xf32> to vector<8x32xf32>
    %289 = arith.addf %287, %288 : vector<8x32xf32>
    %c1_97 = arith.constant 1 : index
    %c0_98 = arith.constant 0 : index
    %c0_99 = arith.constant 0 : index
    %290 = vector.load %arg9[%c1_97, %c0_98, %c0_99] : memref<2x33x64xf32, #tpu.memory_space<vmem>>, vector<1x33x64xf32>
    %291 = vector.shape_cast %290 : vector<1x33x64xf32> to vector<33x64xf32>
    %c1_100 = arith.constant 1 : index
    %c0_101 = arith.constant 0 : index
    %c0_102 = arith.constant 0 : index
    %292 = vector.load %arg10[%c1_100, %c0_101, %c0_102] : memref<2x65x32xf32, #tpu.memory_space<vmem>>, vector<1x65x32xf32>
    %293 = vector.shape_cast %292 : vector<1x65x32xf32> to vector<65x32xf32>
    %294 = vector.extract_strided_slice %291 {offsets = [0, 0], sizes = [32, 64], strides = [1, 1]} : vector<33x64xf32> to vector<32x64xf32>
    %cst_103 = arith.constant dense<0.000000e+00> : vector<8x64xf32>
    %295 = tpu.matmul %289, %294, %cst_103 {dimension_numbers = #tpu.dot_dimension_numbers<[1], [0], [0], [1], [0, 0, 1, 1], [], []>} : vector<8x32xf32>, vector<32x64xf32>, vector<8x64xf32> -> vector<8x64xf32>
    %296 = vector.extract_strided_slice %291 {offsets = [32, 0], sizes = [1, 64], strides = [1, 1]} : vector<33x64xf32> to vector<1x64xf32>
    %297 = vector.broadcast %296 : vector<1x64xf32> to vector<8x64xf32>
    %298 = arith.addf %295, %297 : vector<8x64xf32>
    %cst_104 = arith.constant 0.000000e+00 : f32
    %299 = vector.broadcast %cst_104 : f32 to vector<8x64xf32>
    %300 = arith.maximumf %298, %299 : vector<8x64xf32>
    %301 = vector.extract_strided_slice %293 {offsets = [0, 0], sizes = [64, 32], strides = [1, 1]} : vector<65x32xf32> to vector<64x32xf32>
    %cst_105 = arith.constant dense<0.000000e+00> : vector<8x32xf32>
    %302 = tpu.matmul %300, %301, %cst_105 {dimension_numbers = #tpu.dot_dimension_numbers<[1], [0], [0], [1], [0, 0, 1, 1], [], []>} : vector<8x64xf32>, vector<64x32xf32>, vector<8x32xf32> -> vector<8x32xf32>
    %303 = vector.extract_strided_slice %293 {offsets = [64, 0], sizes = [1, 32], strides = [1, 1]} : vector<65x32xf32> to vector<1x32xf32>
    %304 = vector.broadcast %303 : vector<1x32xf32> to vector<8x32xf32>
    %305 = arith.addf %302, %304 : vector<8x32xf32>
    %306 = arith.addf %289, %305 : vector<8x32xf32>
    %307 = vector.extract_strided_slice %264 {offsets = [2, 0], sizes = [1, 32], strides = [1, 1]} : vector<4x32xf32> to vector<1x32xf32>
    %308 = vector.extract_strided_slice %264 {offsets = [3, 0], sizes = [1, 32], strides = [1, 1]} : vector<4x32xf32> to vector<1x32xf32>
    %cst_106 = arith.constant dense<0.000000e+00> : vector<8xf32>
    %309 = vector.multi_reduction <add>, %306, %cst_106 [1] : vector<8x32xf32> to vector<8xf32>
    %310 = vector.shape_cast %309 : vector<8xf32> to vector<8x1xf32>
    %cst_107 = arith.constant 3.200000e+01 : f32
    %311 = vector.broadcast %cst_107 : f32 to vector<8x1xf32>
    %312 = arith.divf %310, %311 : vector<8x1xf32>
    %313 = vector.broadcast %312 : vector<8x1xf32> to vector<8x32xf32>
    %314 = arith.subf %306, %313 : vector<8x32xf32>
    %315 = arith.mulf %314, %314 : vector<8x32xf32>
    %cst_108 = arith.constant dense<0.000000e+00> : vector<8xf32>
    %316 = vector.multi_reduction <add>, %315, %cst_108 [1] : vector<8x32xf32> to vector<8xf32>
    %317 = vector.shape_cast %316 : vector<8xf32> to vector<8x1xf32>
    %cst_109 = arith.constant 3.200000e+01 : f32
    %318 = vector.broadcast %cst_109 : f32 to vector<8x1xf32>
    %319 = arith.divf %317, %318 : vector<8x1xf32>
    %320 = vector.broadcast %312 : vector<8x1xf32> to vector<8x32xf32>
    %321 = arith.subf %306, %320 : vector<8x32xf32>
    %cst_110 = arith.constant 9.99999974E-6 : f32
    %322 = vector.broadcast %cst_110 : f32 to vector<8x1xf32>
    %323 = arith.addf %319, %322 : vector<8x1xf32>
    %324 = math.rsqrt %323 : vector<8x1xf32>
    %325 = vector.broadcast %324 : vector<8x1xf32> to vector<8x32xf32>
    %326 = arith.mulf %321, %325 : vector<8x32xf32>
    %327 = vector.broadcast %307 : vector<1x32xf32> to vector<8x32xf32>
    %328 = arith.mulf %326, %327 : vector<8x32xf32>
    %329 = vector.broadcast %308 : vector<1x32xf32> to vector<8x32xf32>
    %330 = arith.addf %328, %329 : vector<8x32xf32>
    %c0_111 = arith.constant 0 : index
    %c0_112 = arith.constant 0 : index
    %331 = vector.load %arg11[%c0_111, %c0_112] : memref<33x32xf32, #tpu.memory_space<vmem>>, vector<33x32xf32>
    %c0_113 = arith.constant 0 : index
    %c0_114 = arith.constant 0 : index
    %332 = vector.load %arg12[%c0_113, %c0_114] : memref<33x128xf32, #tpu.memory_space<vmem>>, vector<33x128xf32>
    %333 = vector.extract_strided_slice %331 {offsets = [0, 0], sizes = [32, 32], strides = [1, 1]} : vector<33x32xf32> to vector<32x32xf32>
    %cst_115 = arith.constant dense<0.000000e+00> : vector<8x32xf32>
    %334 = tpu.matmul %330, %333, %cst_115 {dimension_numbers = #tpu.dot_dimension_numbers<[1], [0], [0], [1], [0, 0, 1, 1], [], []>} : vector<8x32xf32>, vector<32x32xf32>, vector<8x32xf32> -> vector<8x32xf32>
    %335 = vector.extract_strided_slice %331 {offsets = [32, 0], sizes = [1, 32], strides = [1, 1]} : vector<33x32xf32> to vector<1x32xf32>
    %336 = vector.broadcast %335 : vector<1x32xf32> to vector<8x32xf32>
    %337 = arith.addf %334, %336 : vector<8x32xf32>
    %cst_116 = arith.constant 0.000000e+00 : f32
    %338 = vector.broadcast %cst_116 : f32 to vector<8x32xf32>
    %339 = arith.cmpf ogt, %337, %338 : vector<8x32xf32>
    %cst_117 = arith.constant 1.000000e-01 : f32
    %340 = vector.broadcast %cst_117 : f32 to vector<8x32xf32>
    %341 = arith.mulf %340, %337 : vector<8x32xf32>
    %342 = arith.select %339, %337, %341 : vector<8x32xi1>, vector<8x32xf32>
    %343 = vector.extract_strided_slice %332 {offsets = [0, 0], sizes = [32, 128], strides = [1, 1]} : vector<33x128xf32> to vector<32x128xf32>
    %cst_118 = arith.constant dense<0.000000e+00> : vector<8x128xf32>
    %344 = tpu.matmul %342, %343, %cst_118 {dimension_numbers = #tpu.dot_dimension_numbers<[1], [0], [0], [1], [0, 0, 1, 1], [], []>} : vector<8x32xf32>, vector<32x128xf32>, vector<8x128xf32> -> vector<8x128xf32>
    %345 = vector.extract_strided_slice %332 {offsets = [32, 0], sizes = [1, 128], strides = [1, 1]} : vector<33x128xf32> to vector<1x128xf32>
    %346 = vector.broadcast %345 : vector<1x128xf32> to vector<8x128xf32>
    %347 = arith.addf %344, %346 : vector<8x128xf32>
    %c0_119 = arith.constant 0 : index
    %c0_120 = arith.constant 0 : index
    %348 = vector.load %arg13[%c0_119, %c0_120] : memref<8x128xf32, #tpu.memory_space<vmem>>, vector<8x128xf32>
    tpu.vector_store %arg13[%c0_119, %c0_120], %347 {strides = array<i32>} : memref<8x128xf32, #tpu.memory_space<vmem>>, vector<8x128xf32>,
    return
  }
  func.func @transform_0(%arg0: i32) -> (i32, i32) {
    %c0_i32 = arith.constant 0 : i32
    %c0_i32_0 = arith.constant 0 : i32
    return %arg0, %c0_i32 : i32, i32
  }
  func.func @transform_1(%arg0: i32) -> (i32, i32) {
    %c0_i32 = arith.constant 0 : i32
    %c0_i32_0 = arith.constant 0 : i32
    return %arg0, %c0_i32 : i32, i32
  }
  func.func @transform_2(%arg0: i32) -> (i32, i32) {
    %c0_i32 = arith.constant 0 : i32
    %c0_i32_0 = arith.constant 0 : i32
    %c0_i32_1 = arith.constant 0 : i32
    return %c0_i32, %c0_i32_0 : i32, i32
  }
  func.func @transform_3(%arg0: i32) -> (i32, i32) {
    %c0_i32 = arith.constant 0 : i32
    %c0_i32_0 = arith.constant 0 : i32
    %c0_i32_1 = arith.constant 0 : i32
    return %c0_i32, %c0_i32_0 : i32, i32
  }
  func.func @transform_4(%arg0: i32) -> (i32, i32) {
    %c0_i32 = arith.constant 0 : i32
    %c0_i32_0 = arith.constant 0 : i32
    %c0_i32_1 = arith.constant 0 : i32
    return %c0_i32, %c0_i32_0 : i32, i32
  }
  func.func @transform_5(%arg0: i32) -> (i32, i32, i32) {
    %c0_i32 = arith.constant 0 : i32
    %c0_i32_0 = arith.constant 0 : i32
    %c0_i32_1 = arith.constant 0 : i32
    %c0_i32_2 = arith.constant 0 : i32
    return %c0_i32, %c0_i32_0, %c0_i32_1 : i32, i32, i32
  }
  func.func @transform_6(%arg0: i32) -> (i32, i32, i32) {
    %c0_i32 = arith.constant 0 : i32
    %c0_i32_0 = arith.constant 0 : i32
    %c0_i32_1 = arith.constant 0 : i32
    %c0_i32_2 = arith.constant 0 : i32
    return %c0_i32, %c0_i32_0, %c0_i32_1 : i32, i32, i32
  }
  func.func @transform_7(%arg0: i32) -> (i32, i32, i32) {
    %c0_i32 = arith.constant 0 : i32
    %c0_i32_0 = arith.constant 0 : i32
    %c0_i32_1 = arith.constant 0 : i32
    %c0_i32_2 = arith.constant 0 : i32
    return %c0_i32, %c0_i32_0, %c0_i32_1 : i32, i32, i32
  }
  func.func @transform_8(%arg0: i32) -> (i32, i32, i32) {
    %c0_i32 = arith.constant 0 : i32
    %c0_i32_0 = arith.constant 0 : i32
    %c0_i32_1 = arith.constant 0 : i32
    %c0_i32_2 = arith.constant 0 : i32
    return %c0_i32, %c0_i32_0, %c0_i32_1 : i32, i32, i32
  }
  func.func @transform_9(%arg0: i32) -> (i32, i32, i32) {
    %c0_i32 = arith.constant 0 : i32
    %c0_i32_0 = arith.constant 0 : i32
    %c0_i32_1 = arith.constant 0 : i32
    %c0_i32_2 = arith.constant 0 : i32
    return %c0_i32, %c0_i32_0, %c0_i32_1 : i32, i32, i32
  }
  func.func @transform_10(%arg0: i32) -> (i32, i32) {
    %c0_i32 = arith.constant 0 : i32
    %c0_i32_0 = arith.constant 0 : i32
    %c0_i32_1 = arith.constant 0 : i32
    return %c0_i32, %c0_i32_0 : i32, i32
  }
  func.func @transform_11(%arg0: i32) -> (i32, i32) {
    %c0_i32 = arith.constant 0 : i32
    %c0_i32_0 = arith.constant 0 : i32
    %c0_i32_1 = arith.constant 0 : i32
    return %c0_i32, %c0_i32_0 : i32, i32
  }
  func.func @transform_12(%arg0: i32) -> (i32, i32) {
    %c0_i32 = arith.constant 0 : i32
    %c0_i32_0 = arith.constant 0 : i32
    return %arg0, %c0_i32 : i32, i32
  }
}

</mosaic_0001>

<bundles_post_ra>
// kernel: tpu_custom_call.1
= control target key start
LH: loop header
LB: loop body
LE: loop exit
PB: predicated region body
PF: predicated region fallthrough
CT: control target
= control target key end

     0   :  { %17 = vsyncpa [#allocation3], 0  ;;  %s5093_s0 = inlined_call_operand.vmem [shape: bf16[16,768], index: 0, kind: input, shape index: {}]   ;;  %s5094_s1 = inlined_call_operand.vmem [shape: f32[16,60], index: 1, kind: input, shape index: {}]   ;;  %s5095_s2 = inlined_call_operand.vmem [shape: f32[8,32], index: 2, kind: input, shape index: {}]   ;;  %s5096_s3 = inlined_call_operand.vmem [shape: bf16[768,64], index: 3, kind: input, shape index: {}]   ;;  %s5097_s4 = inlined_call_operand.vmem [shape: f32[60,32], index: 4, kind: input, shape index: {}]   ;;  %s5098_s5 = inlined_call_operand.vmem [shape: f32[2,33,96], index: 5, kind: input, shape index: {}]   ;;  %s5099_s6 = inlined_call_operand.vmem [shape: f32[2,33,32], index: 6, kind: input, shape index: {}]   ;;  %s5100_s7 = inlined_call_operand.vmem [shape: f32[2,4,32], index: 7, kind: input, shape index: {}]   ;;  %s5101_s8 = inlined_call_operand.vmem [shape: f32[2,33,64], index: 8, kind: input, shape index: {}]   ;;  %s5102_s9 = inlined_call_operand.vmem [shape: f32[2,65,32], index: 9, kind: input, shape index: {}]   ;;  %s5103_s10 = inlined_call_operand.vmem [shape: f32[33,32], index: 10, kind: input, shape index: {}]   ;;  %s5104_s11 = inlined_call_operand.vmem [shape: f32[33,128], index: 11, kind: input, shape index: {}]   ;;  %s5105_s12 = inlined_call_operand.hbm [shape: f32[16,128], index: 12, kind: output, shape index: {}]  }
   0x1   :  { %19 = vsyncpa [#allocation3 + $0x1], 0  ;;  %s4365_s21 = smov 0   ;;  %s4367_s22 = smov 0  }
   0x2   :  { %s4369_s23 = smov 0   ;;  %s4371_s24 = smov 0  }
   0x3 LB: > { %5120 = sst [smem:[#allocation5_spill]] %s4275_s23  ;;  %s4386_s25 = sadd.s32 4294967295, %s4279_s24   ;;  %s4279_s24 = sphi %s4371_s24, %s5136_s24   ;;  %s4275_s23 = sphi %s4369_s23, %s5138_s23   ;;  %s4271_s22 = sphi %s4367_s22, %s5140_s22   ;;  %s4267_s21 = sphi %s4365_s21, %s5139_s21  }
   0x4   : > { %s3454_s26 = sadd.s32 4294967294, %s4279_s24   ;;  %s4390_s27 = sadd.s32 1, %s4279_s24  }
   0x5   : > { %5121 = sst [smem:[#allocation6_spill]] %s4390_s27  ;;  %s294_s28 = sadd.s32 1, %s4275_s23 }
   0x6   : > { %s291_s29 = ssub.s32 %s4279_s24, %s4390_s27  ;;  %p304_p0 = scmp.ne.s32.totalorder %s4275_s23, %s4271_s22 }
   0x7   : > { %p292_p1 = scmp.eq.s32.totalorder %s291_s29, 0  ;;  %p305_p2 = scmp.eq.s32.totalorder %s4386_s25, 1 }
   0x8   : > { %p310_p3 = scmp.ne.s32.totalorder %s4271_s22, %s4267_s21  ;;  %p311_p4 = scmp.eq.s32.totalorder %s3454_s26, 1 }
   0x9   : > { %s4401_s30 = scalar_select %p292_p1, %s4275_s23, %s294_s28  }
   0xa   : > { %p4403_p5 = por %p305_p2, %p304_p0  ;;  %p4407_p6 = por %p311_p4, %p310_p3 }
   0xb   : > { %5122 = sst [smem:[#allocation7_spill]] %s4401_s30  ;;  %p3457_p7 = scmp.ge.s32.totalorder %s4279_s24, 1 }
   0xc   : > { %p374_p8 = scmp.lt.s32.totalorder %s4279_s24, 3 }
   0xe   : > { %p375_p9 = pnand %p3457_p7, %p374_p8 }
   0xf   : > { %v4123_v0 = vld [vmem:[%s5096_s3 + $0x40] sm:$0xff] (!%p375_p9)   ;;  %v4127_v4 = vld [vmem:[%s5096_s3 + $0x48] sm:$0xff] (!%p375_p9)   ;;  %v4131_v8 = vld [vmem:[%s5096_s3 + $0x50] sm:$0xff] (!%p375_p9)   ;;  %p420_p10 = scmp.lt.s32.totalorder (!%p375_p9), %s4386_s25, 1  ;;  %v4281_v40 = vmov (!%p375_p9), 0.0|0.0   ;;  %vm4282_vm0 = vmmov (!%p375_p9), 0  }
  0x10   : > { %378 = sbr.rel (%p375_p9) target bundleno = 6393 (0x18f9), region = 68  ;;  %v4124_v1 = vld [vmem:[%s5096_s3 + $0xc0] sm:$0xff] (!%p375_p9)   ;;  %3590 = vmatprep.subr.bf16.mxu0 (!%p375_p9), %v4123_v0  ;;  %v4128_v5 = vld [vmem:[%s5096_s3 + $0xc8] sm:$0xff] (!%p375_p9)   ;;  %v4132_v9 = vld [vmem:[%s5096_s3 + $0xd0] sm:$0xff] (!%p375_p9)   ;;  %v4283_v42 = vmov (!%p375_p9), 0.0   ;;  %vm976_vm1 = vcmask (!%p375_p9), 1043456  }
  0x11   : > { %v4125_v2 = vld [vmem:[%s5096_s3] sm:$0xff] (!%p375_p9)   ;;  %3612 = vmatprep.subr.bf16.mxu1 (!%p375_p9), %v4124_v1  ;;  %v4129_v6 = vld [vmem:[%s5096_s3 + $0x8] sm:$0xff] (!%p375_p9)   ;;  %v4133_v10 = vld [vmem:[%s5096_s3 + $0x10] sm:$0xff] (!%p375_p9)   ;;  %vm4284_vm2 = vmmov (!%p375_p9), 1   ;;  %vm972_vm4 = vcmask (!%p375_p9), 490496   ;;  %vm1071_vm5 = vcmask (!%p375_p9), 261120  }
  0x12   : > { %v4126_v3 = vld [vmem:[%s5096_s3 + $0x80] sm:$0xff] (!%p375_p9)   ;;  %3591 = vmatpush3.bf16.msra.mxu0 (!%p375_p9), %v4125_v2  ;;  %v4130_v7 = vld [vmem:[%s5096_s3 + $0x88] sm:$0xff] (!%p375_p9)   ;;  %v4134_v11 = vld [vmem:[%s5096_s3 + $0x90] sm:$0xff] (!%p375_p9)   ;;  %s5111_s30 = smov (!%p375_p9), 64   ;;  %s5119_s27 = smov (!%p375_p9), 120   ;;  %vm1148_vm6 = vcmask (!%p375_p9), 64512  }
  0x13   : > { %3613 = vmatpush3.bf16.msra.mxu1 (!%p375_p9), %v4126_v3  ;;  %3592 = vmatprep.subr.bf16.mxu0 (!%p375_p9), %v4127_v4  ;;  %v4135_v12 = vld [vmem:[%s5096_s3 + $0x58] sm:$0xff] (!%p375_p9)   ;;  %v4139_v16 = vld [vmem:[%s5096_s3 + $0x60] sm:$0xff] (!%p375_p9)   ;;  %v4143_v20 = vld [vmem:[%s5096_s3 + $0x68] sm:$0xff] (!%p375_p9)   ;;  %s5113_s15 = smov (!%p375_p9), 72   ;;  %s4291_s16 = smov (!%p375_p9), 88   ;;  %vm1826_vm8 = vcmask (!%p375_p9), 130048  }
  0x14   : > { %3614 = vmatprep.subr.bf16.mxu1 (!%p375_p9), %v4128_v5  ;;  %v4136_v13 = vld [vmem:[%s5096_s3 + $0xd8] sm:$0xff] (!%p375_p9)   ;;  %v4140_v17 = vld [vmem:[%s5096_s3 + $0xe0] sm:$0xff] (!%p375_p9)   ;;  %v4144_v21 = vld [vmem:[%s5096_s3 + $0xe8] sm:$0xff] (!%p375_p9)   ;;  %s5115_s17 = smov (!%p375_p9), 104   ;;  %s5109_s26 = smov (!%p375_p9), 40   ;;  %vm1828_vm9 = vcmask (!%p375_p9), 195584  }
  0x15   : > { %v4137_v14 = vld [vmem:[%s5096_s3 + $0x18] sm:$0xff] (!%p375_p9)   ;;  %v4141_v18 = vld [vmem:[%s5096_s3 + $0x20] sm:$0xff] (!%p375_p9)   ;;  %v4145_v22 = vld [vmem:[%s5096_s3 + $0x28] sm:$0xff] (!%p375_p9)   ;;  %s5110_s28 = smov (!%p375_p9), 48   ;;  %vm2034_vm10 = vcmask (!%p375_p9), 523264  }
  0x16   : > { %3593 = vmatpush3.bf16.msra.mxu0 (!%p375_p9), %v4129_v6  ;;  %v4138_v15 = vld [vmem:[%s5096_s3 + $0x98] sm:$0xff] (!%p375_p9)   ;;  %v4142_v19 = vld [vmem:[%s5096_s3 + $0xa0] sm:$0xff] (!%p375_p9)   ;;  %v4146_v23 = vld [vmem:[%s5096_s3 + $0xa8] sm:$0xff] (!%p375_p9)  }
  0x17   : > { %3615 = vmatpush3.bf16.msra.mxu1 %v4130_v7  ;;  %3594 = vmatprep.subr.bf16.mxu0 %v4131_v8  ;;  %s4481_s19 = scalar_select %p420_p10, %s4386_s25, 1  ;;  %v4147_v24 = vld [vmem:[%s5096_s3 + $0x70] sm:$0xff]   ;;  %v4151_v28 = vld [vmem:[%s5096_s3 + $0x78] sm:$0xff]   ;;  %v4159_v38 = vld [vmem:[%s5096_s3 + $0x140] sm:$0xff]  }
  0x18   : > { %3616 = vmatprep.subr.bf16.mxu1 %v4132_v9  ;;  %v4148_v25 = vld [vmem:[%s5096_s3 + $0xf0] sm:$0xff]   ;;  %v4152_v29 = vld [vmem:[%s5096_s3 + $0xf8] sm:$0xff]   ;;  %v4160_v39 = vld [vmem:[%s5096_s3 + $0x100] sm:$0xff]  }
  0x19   : > { %s4065_s18 = smul.u32 24, %s4481_s19  ;;  %v4149_v26 = vld [vmem:[%s5096_s3 + $0x30] sm:$0xff]   ;;  %v4153_v30 = vld [vmem:[%s5096_s3 + $0x38] sm:$0xff]   ;;  %v4161_v41 = vld [vmem:[%s5096_s3 + $0x148] sm:$0xff]   ;;  %s3460_s29 = sshll.u32 %s4481_s19, 3 }
  0x1a   : > { %3595 = vmatpush3.bf16.msra.mxu0 %v4133_v10  ;;  %v4150_v27 = vld [vmem:[%s5096_s3 + $0xb0] sm:$0xff]   ;;  %v4154_v31 = vld [vmem:[%s5096_s3 + $0xb8] sm:$0xff]   ;;  %v4162_v43 = vld [vmem:[%s5096_s3 + $0x108] sm:$0xff]   ;;  %s428_s20 = scalar_lea.vmem %s5094_s1, %s3460_s29  ;;  %s4289_s29 = smov 112  }
  0x1b   : > { %3617 = vmatpush3.bf16.msra.mxu1 %v4134_v11  ;;  %3596 = vmatprep.subr.bf16.mxu0 %v4135_v12  ;;  %s4511_s23 = scalar_lea.vmem %s5093_s0, %s4065_s18  ;;  %v4163_v44 = vld [vmem:[%s5096_s3 + $0x150] sm:$0xff]   ;;  %v4165_v46 = vld [vmem:[%s5096_s3 + $0x158] sm:$0xff]   ;;  %v4167_v48 = vld [vmem:[%s5096_s3 + $0x160] sm:$0xff]   ;;  %s5114_s18 = smov 80  }
  0x1c   : > { %3618 = vmatprep.subr.bf16.mxu1 %v4136_v13  ;;  %v430_v32 = vld [vmem:[%s4511_s23] sm:$0xff]  ;;  %v431_v33 = vld [vmem:[%s4511_s23 + $0x8] sm:$0xff]  ;;  %v4164_v45 = vld [vmem:[%s5096_s3 + $0x110] sm:$0xff]   ;;  %s417_s19 = sand.u32 1, %s4271_s22  }
  0x1d   : > { %v3461_v34 = vcombine.low %v430_v32, %v430_v32  ;;  %v3462_v35 = vcombine.high %v430_v32, %v430_v32  ;;  %v3463_v36 = vcombine.low %v431_v33, %v431_v33  ;;  %v3464_v37 = vcombine.high %v431_v33, %v431_v33  ;;  %v4166_v47 = vld [vmem:[%s5096_s3 + $0x118] sm:$0xff]   ;;  %v432_v49 = vld [vmem:[%s4511_s23 + $0x10] sm:$0xff]  ;;  %v964_v51 = vld [vmem:[%s5097_s4] sm:$0xff]  ;;  %s4285_s23 = smov 96  }
  0x1e   : > { %3597 = vmatpush3.bf16.msra.mxu0 %v4137_v14  ;;  %v3466_v50 = vcombine.high %v432_v49, %v432_v49  ;;  %v965_v52 = vld [vmem:[%s5097_s4 + $0x8] sm:$0xff]  ;;  %v966_v53 = vld [vmem:[%s5097_s4 + $0x10] sm:$0xff]  ;;  %v4168_v54 = vld [vmem:[%s5096_s3 + $0x120] sm:$0xff]   ;;  %v3465_v7 = vcombine.low %v432_v49, %v432_v49 }
  0x1f   : > { %3619 = vmatpush3.bf16.msra.mxu1 %v4138_v15  ;;  %3598 = vmatprep.subr.bf16.mxu0 %v4139_v16  ;;  %v3981_v55 = vpack.c.bf16 %v965_v52, %v964_v51  ;;  %v967_v56 = vld [vmem:[%s5097_s4 + $0x18] sm:$0xff]  ;;  %v4169_v57 = vld [vmem:[%s5096_s3 + $0x168] sm:$0xff]   ;;  %v968_v59 = vld [vmem:[%s5097_s4 + $0x20] sm:$0xff] }
  0x20   : > { %3620 = vmatprep.subr.bf16.mxu1 %v4140_v17  ;;  %870 = vmatprep.mubr.bf16.mxu0 %v3462_v35  ;;  %v3984_v58 = vpack.c.bf16 %v967_v56, %v966_v53  ;;  %v969_v60 = vld [vmem:[%s5097_s4 + $0x28] sm:$0xff]  ;;  %v4171_v62 = vld [vmem:[%s5096_s3 + $0x170] sm:$0xff]   ;;  %v971_v1 = vld [vmem:[%s5097_s4 + $0x38] sm:$0xf] }
  0x21   : > { %910 = vmatprep.mubr.bf16.mxu1 %v3464_v37  ;;  %v4170_v61 = vld [vmem:[%s5096_s3 + $0x128] sm:$0xff]   ;;  %v3987_v63 = vpack.c.bf16 %v969_v60, %v968_v59  ;;  %v970_v0 = vld [vmem:[%s5097_s4 + $0x30] sm:$0xff]  ;;  %v4173_v3 = vld [vmem:[%s5096_s3 + $0x178] sm:$0xff]  }
  0x22   : > { %3599 = vmatpush3.bf16.msra.mxu0 %v4141_v18  ;;  %v4172_v2 = vld [vmem:[%s5096_s3 + $0x130] sm:$0xff]   ;;  %v3990_v4 = vpack.c.bf16 %v971_v1, %v970_v0  ;;  %vm3991_vm3 = vmpackc.low %vm976_vm1, %vm4284_vm2  ;;  %v4174_v5 = vld [vmem:[%s5096_s3 + $0x138] sm:$0xff]  }
  0x23   : > { %3621 = vmatpush3.bf16.msra.mxu1 %v4142_v19  ;;  %3600 = vmatprep.subr.bf16.mxu0 %v4143_v20  ;;  %v963_v6 = vld [vmem:[%s428_s20] sm:$0xff]  ;;  %v1063_v9 = vld [vmem:[%s5098_s5 + $0x8] sm:$0xff]  ;;  %s5112_s20 = smov 56  }
  0x24   : > { %3622 = vmatprep.subr.bf16.mxu1 %v4144_v21  ;;  %v1062_v8 = vld [vmem:[%s5098_s5] sm:$0xff] }
  0x25   : > { %v3994_v10 = vpack.c.bf16 %v1063_v9, %v1062_v8 }
  0x26   : > { %3601 = vmatpush3.bf16.msra.mxu0 %v4145_v22  ;;  %v1064_v22 = vld [vmem:[%s5098_s5 + $0x10] sm:$0xff] }
  0x27   : > { %3623 = vmatpush3.bf16.msra.mxu1 %v4146_v23  ;;  %3602 = vmatprep.subr.bf16.mxu0 %v4147_v24  ;;  %v1065_v23 = vld [vmem:[%s5098_s5 + $0x18] sm:$0xff] }
  0x28   : > { %3624 = vmatprep.subr.bf16.mxu1 %v4148_v25  ;;  %v3997_v24 = vpack.c.bf16 %v1065_v23, %v1064_v22 }
  0x2a   : > { %3603 = vmatpush3.bf16.msra.mxu0 %v4149_v26 }
  0x2b   : > { %3625 = vmatpush3.bf16.msra.mxu1 %v4150_v27  ;;  %3604 = vmatprep.subr.bf16.mxu0 %v4151_v28 }
  0x2c   : > { %3626 = vmatprep.subr.bf16.mxu1 %v4152_v29 }
  0x2e   : > { %3605 = vmatpush3.bf16.msra.mxu0 %v4153_v30 }
  0x2f   : > { %3627 = vmatpush3.bf16.msra.mxu1 %v4154_v31  ;;  %3634 = vmatprep.subr.bf16.mxu0 %v4159_v38 }
  0x30   : > { %3980 = vmatprep.subr.bf16.mxu1 %v4281_v40 }
  0x31   : > { %871 = vmatmul.mubr.bf16.vlgmr.msra.gmra.mrb[0].mxu0 %v3461_v34 }
  0x32   : > { %911 = vmatmul.mubr.bf16.vlgmr.msra.gmra.mrb[0].mxu1 %v3463_v36  ;;  %3635 = vmatpush3.bf16.msra.mxu0 %v4160_v39  ;;  %v1056_v36 = vld [vmem:[%s5095_s2] sm:$0xff] }
  0x33   : > { %3771 = vmatprep.mubr.msk.f32.mxu1 %vm4282_vm0, %v4283_v42  ;;  %3636 = vmatprep.subr.bf16.mxu0 %v4161_v41  ;;  %v3517_v39 = vld [vmem:[%s5098_s5 + $0x20] ss:$0 sm:$0xff] }
  0x34   : > { %950 = vmatprep.mubr.bf16.mxu0 %v3466_v50  ;;  %3982 = vmatpush3.bf16.msra.mxu1 %v3981_v55 }
  0x35   : > { %3983 = vmatprep.subr.bf16.mxu1 %v4281_v40 }
  0x36   : > { %3637 = vmatpush3.bf16.msra.mxu0 %v4162_v43 }
  0x37   : > { %3638 = vmatprep.subr.bf16.mxu0 %v4163_v44 }
  0x38   : > { %3985 = vmatpush3.bf16.msra.mxu1 %v3984_v58 }
  0x39   : > { %3986 = vmatprep.subr.bf16.mxu1 %v4281_v40 }
  0x3a   : > { %3639 = vmatpush3.bf16.msra.mxu0 %v4164_v45 }
  0x3b   : > { %3640 = vmatprep.subr.bf16.mxu0 %v4165_v46 }
  0x3c   : > { %3988 = vmatpush3.bf16.msra.mxu1 %v3987_v63 }
  0x3d   : > { %3989 = vmatprep.subr.bf16.mxu1 %v4281_v40 }
  0x3e   : > { %3641 = vmatpush3.bf16.msra.mxu0 %v4166_v47  ;;  %v1058_v47 = vlaneseq }
  0x3f   : > { %3642 = vmatprep.subr.bf16.mxu0 %v4167_v48 }
  0x40   : > { %3992 = vmatpush3.bf16.msk.msra.mxu1 %vm3991_vm3, %v3990_v4  ;;  %v1059_v48 = vand.u32 127, %v1058_v47 }
  0x41   : > { %3993 = vmatprep.subr.bf16.mxu1 %v4281_v40 }
  0x42   : > { %3643 = vmatpush3.bf16.msra.mxu0 %v4168_v54  ;;  %vm1060_vm7 = vcmp.eq.s32.totalorder %v1059_v48, 7 }
  0x43   : > { %3644 = vmatprep.subr.bf16.mxu0 %v4169_v57  ;;  %3772 = vmatmul.mubr.msk.f32.vlgmr.msra.gmra.mrb[4].mxu1 %vm972_vm4, %v963_v6  ;;  %v4660_v50 = vsel %vm1060_vm7, -1e+30, %v4283_v42 }
  0x44   : > { %3782 = vmatprep.mubr.msk.f32.mxu1 %vm4282_vm0, %v4283_v42  ;;  %3995 = vmatpush3.bf16.msra.mxu1 %v3994_v10 }
  0x45   : > { %3996 = vmatprep.subr.bf16.mxu1 %v4281_v40 }
  0x46   : > { %3645 = vmatpush3.bf16.msra.mxu0 %v4170_v61 }
  0x47   : > { %3646 = vmatprep.subr.bf16.mxu0 %v4171_v62 }
  0x48   : > { %3998 = vmatpush3.bf16.msra.mxu1 %v3997_v24 }
  0x49   : > { %3785 = vmatprep.subr.mxu1 %v4283_v42 }
  0x4a   : > { %3647 = vmatpush3.bf16.msra.mxu0 %v4172_v2 }
  0x4b   : > { %3648 = vmatprep.subr.bf16.mxu0 %v4173_v3 }
  0x4e   : > { %3649 = vmatpush3.bf16.msra.mxu0 %v4174_v5 }
  0x4f   : > { %3800 = vmatprep.subr.mxu0 %v4283_v42 }
  0x51   : > { %951 = vmatmul.mubr.bf16.vlgmr.msra.gmra.mrb[4].mxu0 %v3465_v7 }
  0x52   : > { %3802 = vmatprep.mubr.msk.f32.mxu0 %vm4282_vm0, %v4283_v42 }
 0x104   : > { %v3606_v11 = vpop.f32.mrb[0].mxu0 }
 0x105   : > { %v3628_v12 = vpop.f32.mrb[0].mxu1  ;;  %v3607_v13 = vpop.f32.mrb[1].mxu0 }
 0x106   : > { %v3629_v14 = vpop.f32.mrb[1].mxu1  ;;  %v3608_v15 = vadd.f32 %v3607_v13, %v3606_v11  ;;  %v3609_v17 = vpop.f32.mrb[2].mxu0 }
 0x107   : > { %v3630_v16 = vadd.f32 %v3629_v14, %v3628_v12  ;;  %v3631_v18 = vpop.f32.mrb[2].mxu1  ;;  %v3610_v19 = vpop.f32.mrb[3].mxu0 }
 0x108   : > { %v3632_v20 = vpop.f32.mrb[3].mxu1 }
 0x109   : > { %v913_v21 = vadd.f32 %v3630_v16, %v3608_v15 }
 0x116   : > { %v1046_v25 = vpop.f32.mrb[4].mxu1 }
 0x117   : > { %v3773_v26 = vpop.f32.mrb[5].mxu1 }
 0x124   : > { %v3650_v27 = vpop.f32.mrb[4].mxu0 }
 0x125   : > { %v3651_v28 = vpop.f32.mrb[5].mxu0 }
 0x126   : > { %v3652_v29 = vadd.f32 %v3651_v28, %v3650_v27  ;;  %v3653_v30 = vpop.f32.mrb[6].mxu0 }
 0x127   : > { %v3654_v31 = vpop.f32.mrb[7].mxu0 }
 0x128   : > { %v953_v32 = vadd.f32 %v3652_v29, %v913_v21 }
 0x12a   : > { %v959_v33 = vrot.slane %v953_v32, 1 }
 0x12c   : > { %1051 = vrot.lane.b32.xlu0 %v959_v33, %s4285_s23 }
 0x19e   : > { %v1052_v34 = vpop.permute.xlu0 %1051 }
 0x19f   : > { %v1054_v35 = vadd.f32 %v1052_v34, %v953_v32 }
 0x1a1   : > { %v1055_v37 = vadd.f32 %v1054_v35, %v1046_v25 }
 0x1a3   : > { %v4628_v38 = vadd.f32 %v1056_v36, %v1055_v37 }
 0x1a5   : > { %3783 = vmatmul.mubr.msk.f32.vlgmr.msra.gmra.mrb[6].mxu1 %vm1071_vm5, %v4628_v38 }
 0x1a6   : > { %3787 = vmatprep.mubr.msk.f32.mxu1 %vm4282_vm0, %v4283_v42 }
 0x278   : > { %v1141_v41 = vpop.f32.mrb[6].mxu1 }
 0x279   : > { %v4637_v43 = vadd.f32 %v3517_v39, %v1141_v41  ;;  %v3784_v44 = vpop.f32.mrb[7].mxu1 }
 0x27b   : > { %1146 = vrot.lane.b32.xlu0 %v4637_v43, %s4285_s23 }
 0x27f   : > { %1236 = vrot.lane.b32.xlu0 %v4637_v43, %s5111_s30  ;;  %s5117_s30 = smov 16  }
 0x283   : > { %1312 = vrot.lane.b32.xlu0 %v4637_v43, %s5119_s27  ;;  %s3458_s27 = sshll.u32 %s417_s19, 3 }
 0x287   : > { %1481 = vrot.lane.b32.xlu0 %v4637_v43, %s5114_s18 }
 0x28b   : > { %1479 = vrot.lane.b32.xlu0 %v4637_v43, %s4289_s29 }
 0x28f   : > { %1648 = vrot.lane.b32.xlu0 %v4637_v43, %s5113_s15  ;;  %s5116_s15 = smov 24  }
 0x2ed   : > { %v1147_v45 = vpop.permute.xlu0 %1146 }
 0x2ee   : > { %3786 = vmatpush3.xpose.msk.msra.mxu1 %vm1148_vm6, %v1147_v45 }
 0x2ef   : > { %3790 = vmatprep.subr.mxu1 %v4283_v42 }
 0x2f1   : > { %3788 = vmatmul.mubr.msk.f32.vlgmr.msra.gmra.mrb[8].mxu1 %vm1148_vm6, %v4637_v43  ;;  %v1237_v46 = vpop.permute.xlu0 %1236 }
 0x2f2   : > { %3791 = vmatpush3.msra.mxu1 %v1237_v46  ;;  %3792 = vmatprep.mubr.msk.f32.mxu1 %vm4282_vm0, %v4283_v42 }
 0x2f3   : > { %3795 = vmatprep.subr.mxu1 %v4283_v42 }
 0x2f5   : > { %v1313_v61 = vpop.permute.xlu0 %1312 }
 0x2f9   : > { %v1482_v62 = vpop.permute.xlu0 %1481 }
 0x2fd   : > { %v1480_v2 = vpop.permute.xlu0 %1479 }
 0x301   : > { %v1649_v3 = vpop.permute.xlu0 %1648 }
 0x3c4   : > { %v1219_v49 = vpop.f32.mrb[8].mxu1 }
 0x3c5   : > { %v1223_v51 = vmul.f32 0.35355338, %v1219_v49  ;;  %v3789_v52 = vpop.f32.mrb[9].mxu1 }
 0x3c7   : > { %v1224_v53 = vadd.f32 %v1223_v51, %v4660_v50 }
 0x3c9   : > { %v1225_v54 = vsel %vm1148_vm6, %v1224_v53, -inf }
 0x3ca   : > { %1226 = vmax.xlane.f32.xlu1 %v1225_v54  ;;  %v1830_v54 = vld [vmem:[%s5099_s6] sm:$0xff] }
 0x457   : > { %v1227_v55 = vpop.xlane.xlu1 %1226 }
 0x458   : > { %v1228_v56 = vsub.f32 %v1224_v53, %v1227_v55  ;;  %v1831_v55 = vld [vmem:[%s5099_s6 + $0x8] sm:$0xff] }
 0x45a   : > { %v1229_v57 = vmul.f32 1.442695, %v1228_v56  ;;  %v4000_v56 = vpack.c.bf16 %v1831_v55, %v1830_v54 }
 0x45c   : > { %4177 = vpow2.f32 %v1229_v57  ;;  %v1832_v57 = vld [vmem:[%s5099_s6 + $0x10] sm:$0xff] }
 0x466   : > { %v4178_v58 = vpop.eup %4177 }
 0x467   : > { %v1231_v59 = vsel %vm1148_vm6, %v4178_v58, 0.0 }
 0x468   : > { %1232 = vadd.xlane.f32.xlu1 %v1231_v59 }
 0x479   : > { %1314 = vrot.lane.b32.xlu1 %v4637_v43, %s4291_s16 }
 0x47d   : > { %1646 = vrot.lane.b32.xlu1 %v4637_v43, %s5115_s17  ;;  %s5126_s17 = smov 104  }
 0x4f5   : > { %v1233_v60 = vpop.xlane.xlu1 %1232 }
 0x4f6   : > { %4179 = vrcp.f32 %v1233_v60 }
 0x4f9   : > { %v1315_v1 = vpop.permute.xlu1 %1314 }
 0x4fd   : > { %v1647_v4 = vpop.permute.xlu1 %1646 }
 0x500   : > { %v4180_v63 = vpop.eup %4179 }
 0x501   : > { %v1235_v0 = vmul.f32 %v4180_v63, %v4178_v58  ;;  %v1833_v58 = vld [vmem:[%s5099_s6 + $0x18] sm:$0xff] }
 0x502   : > { %v4003_v59 = vpack.c.bf16 %v1833_v58, %v1832_v57  ;;  %v3535_v58 = vld [vmem:[%s5102_s9 + $0x40] ss:$0 sm:$0xff] }
 0x503   : > { %3793 = vmatmul.mubr.msk.f32.vlgmr.msra.gmra.mrb[10].mxu1 %vm1148_vm6, %v1235_v0 }
 0x504   : > { %3796 = vmatpush3.xpose.msk.msra.mxu1 %vm1148_vm6, %v1315_v1  ;;  %3797 = vmatprep.mubr.msk.f32.mxu1 %vm4282_vm0, %v4283_v42 }
 0x505   : > { %3805 = vmatprep.subr.mxu1 %v4283_v42 }
 0x507   : > { %3798 = vmatmul.mubr.msk.f32.vlgmr.msra.gmra.mrb[12].mxu1 %vm1148_vm6, %v1313_v61 }
 0x508   : > { %3806 = vmatpush3.xpose.msk.msra.mxu1 %vm1148_vm6, %v1482_v62  ;;  %3807 = vmatprep.mubr.msk.f32.mxu1 %vm4282_vm0, %v4283_v42 }
 0x509   : > { %3815 = vmatprep.subr.mxu1 %v4283_v42 }
 0x50b   : > { %3808 = vmatmul.mubr.msk.f32.vlgmr.msra.gmra.mrb[14].mxu1 %vm1148_vm6, %v1480_v2 }
 0x50c   : > { %3816 = vmatpush3.xpose.msk.msra.mxu1 %vm1148_vm6, %v1649_v3  ;;  %3817 = vmatprep.mubr.msk.f32.mxu1 %vm4282_vm0, %v4283_v42 }
 0x50d   : > { %3999 = vmatprep.subr.bf16.mxu1 %v4281_v40 }
 0x50f   : > { %3818 = vmatmul.mubr.msk.f32.vlgmr.msra.gmra.mrb[16].mxu1 %vm1148_vm6, %v1647_v4 }
 0x510   : > { %3833 = vmatprep.mubr.msk.f32.mxu1 %vm4282_vm0, %v4283_v42  ;;  %4001 = vmatpush3.bf16.msra.mxu1 %v4000_v56 }
 0x511   : > { %4002 = vmatprep.subr.bf16.mxu1 %v4281_v40 }
 0x514   : > { %4004 = vmatpush3.bf16.msra.mxu1 %v4003_v59 }
 0x515   : > { %4011 = vmatprep.subr.bf16.mxu1 %v4281_v40 }
 0x5d6   : > { %v4687_v5 = vpop.f32.mrb[10].mxu1 }
 0x5d7   : > { %v3794_v6 = vpop.f32.mrb[11].mxu1 }
 0x5da   : > { %v1386_v7 = vpop.f32.mrb[12].mxu1 }
 0x5db   : > { %v1390_v8 = vmul.f32 0.35355338, %v1386_v7  ;;  %v3799_v9 = vpop.f32.mrb[13].mxu1 }
 0x5dc   : > { %v3531_v9 = vld [vmem:[%s5099_s6 + $0x20] ss:$0 sm:$0xff] }
 0x5dd   : > { %v1391_v10 = vadd.f32 %v1390_v8, %v4660_v50 }
 0x5de   : > { %v1553_v11 = vpop.f32.mrb[14].mxu1 }
 0x5df   : > { %v1557_v12 = vmul.f32 0.35355338, %v1553_v11  ;;  %v3809_v13 = vpop.f32.mrb[15].mxu1  ;;  %v1392_v14 = vsel %vm1148_vm6, %v1391_v10, -inf }
 0x5e0   : > { %1393 = vmax.xlane.f32.xlu0 %v1392_v14 }
 0x5e1   : > { %v1558_v15 = vadd.f32 %v1557_v12, %v4660_v50 }
 0x5e2   : > { %v1720_v16 = vpop.f32.mrb[16].mxu1 }
 0x5e3   : > { %v1724_v17 = vmul.f32 0.35355338, %v1720_v16  ;;  %v3819_v18 = vpop.f32.mrb[17].mxu1  ;;  %v1559_v19 = vsel %vm1148_vm6, %v1558_v15, -inf }
 0x5e4   : > { %1560 = vmax.xlane.f32.xlu1 %v1559_v19  ;;  %v1938_v19 = vld [vmem:[%s5101_s8] sm:$0xff] }
 0x5e5   : > { %v1725_v20 = vadd.f32 %v1724_v17, %v4660_v50 }
 0x5e7   : > { %v1726_v21 = vsel %vm1148_vm6, %v1725_v20, -inf }
 0x5e8   : > { %1727 = vmax.xlane.f32.xlu0 %v1726_v21 }
 0x5f5   : > { %1403 = vrot.lane.b32.xlu1 %v4637_v43, %s5112_s20  ;;  %s5132_s20 = smov 40  }
 0x66d   : > { %v1394_v22 = vpop.xlane.xlu0 %1393 }
 0x66e   : > { %v1395_v23 = vsub.f32 %v1391_v10, %v1394_v22  ;;  %v1941_v22 = vld [vmem:[%s5101_s8 + $0x18] sm:$0xff] }
 0x670   : > { %v1396_v24 = vmul.f32 1.442695, %v1395_v23 }
 0x671   : > { %v1561_v25 = vpop.xlane.xlu1 %1560 }
 0x672   : > { %4181 = vpow2.f32 %v1396_v24  ;;  %v1562_v26 = vsub.f32 %v1558_v15, %v1561_v25  ;;  %v1943_v24 = vld [vmem:[%s5102_s9] sm:$0xff]  ;;  %v1944_v25 = vld [vmem:[%s5102_s9 + $0x8] sm:$0xff] }
 0x674   : > { %v1563_v27 = vmul.f32 1.442695, %v1562_v26  ;;  %v1945_v26 = vld [vmem:[%s5102_s9 + $0x10] sm:$0xff] }
 0x675   : > { %v1404_v28 = vpop.permute.xlu1 %1403  ;;  %v1728_v29 = vpop.xlane.xlu0 %1727 }
 0x676   : > { %4183 = vpow2.f32 %v1563_v27  ;;  %v1729_v30 = vsub.f32 %v1725_v20, %v1728_v29  ;;  %3801 = vmatpush3.msra.mxu0 %v1404_v28  ;;  %v1939_v20 = vld [vmem:[%s5101_s8 + $0x8] sm:$0xff]  ;;  %v4012_v27 = vpack.c.bf16 %v1944_v25, %v1943_v24  ;;  %v1946_v28 = vld [vmem:[%s5102_s9 + $0x18] sm:$0xff] }
 0x677   : > { %3810 = vmatprep.subr.mxu0 %v4283_v42  ;;  %v4006_v21 = vpack.c.bf16 %v1939_v20, %v1938_v19  ;;  %v4015_v29 = vpack.c.bf16 %v1946_v28, %v1945_v26 }
 0x678   : > { %v1730_v31 = vmul.f32 1.442695, %v1729_v30  ;;  %v1947_v30 = vld [vmem:[%s5102_s9 + $0x20] sm:$0xff] }
 0x67a   : > { %4185 = vpow2.f32 %v1730_v31  ;;  %v1948_v31 = vld [vmem:[%s5102_s9 + $0x28] sm:$0xff] }
 0x67c   : > { %v4182_v32 = vpop.eup %4181 }
 0x67d   : > { %v1398_v33 = vsel %vm1148_vm6, %v4182_v32, 0.0 }
 0x67e   : > { %1399 = vadd.xlane.f32.xlu0 %v1398_v33 }
 0x680   : > { %v4184_v34 = vpop.eup %4183 }
 0x681   : > { %v1565_v35 = vsel %vm1148_vm6, %v4184_v34, 0.0 }
 0x682   : > { %1566 = vadd.xlane.f32.xlu1 %v1565_v35 }
 0x684   : > { %v4186_v36 = vpop.eup %4185 }
 0x685   : > { %v1732_v37 = vsel %vm1148_vm6, %v4186_v36, 0.0 }
 0x686   : > { %1733 = vadd.xlane.f32.xlu0 %v1732_v37 }
 0x693   : > { %1737 = vrot.lane.b32.xlu1 %v4637_v43, %s5109_s26  ;;  %s5118_s26 = smov 8  }
 0x69c   : > { %1570 = vrot.lane.b32.xlu0 %v4637_v43, %s5110_s28 }
 0x70b   : > { %v1400_v39 = vpop.xlane.xlu0 %1399 }
 0x70c   : > { %4187 = vrcp.f32 %v1400_v39  ;;  %v1912_v39 = vld [vmem:[%s5100_s7] sm:$0xf] }
 0x70f   : > { %v1567_v41 = vpop.xlane.xlu1 %1566 }
 0x710   : > { %4189 = vrcp.f32 %v1567_v41 }
 0x713   : > { %v1734_v44 = vpop.xlane.xlu0 %1733  ;;  %v1738_v43 = vpop.permute.xlu1 %1737 }
 0x714   : > { %4191 = vrcp.f32 %v1734_v44 }
 0x716   : > { %v4188_v45 = vpop.eup %4187 }
 0x717   : > { %v1402_v46 = vmul.f32 %v4188_v45, %v4182_v32  ;;  %v1571_v48 = vpop.permute.xlu0 %1570  ;;  %v4018_v32 = vpack.c.bf16 %v1948_v31, %v1947_v30 }
 0x719   : > { %3803 = vmatmul.mubr.msk.f32.vlgmr.msra.gmra.mrb[8].mxu0 %vm1148_vm6, %v1402_v46 }
 0x71a   : > { %v4190_v49 = vpop.eup %4189  ;;  %3811 = vmatpush3.msra.mxu0 %v1571_v48  ;;  %3812 = vmatprep.mubr.msk.f32.mxu0 %vm4282_vm0, %v4283_v42 }
 0x71b   : > { %v1569_v51 = vmul.f32 %v4190_v49, %v4184_v34  ;;  %3820 = vmatprep.subr.mxu0 %v4283_v42 }
 0x71d   : > { %3813 = vmatmul.mubr.msk.f32.vlgmr.msra.gmra.mrb[10].mxu0 %vm1148_vm6, %v1569_v51 }
 0x71e   : > { %v4192_v52 = vpop.eup %4191  ;;  %3821 = vmatpush3.msra.mxu0 %v1738_v43  ;;  %3822 = vmatprep.mubr.msk.f32.mxu0 %vm4282_vm0, %v4283_v42  ;;  %v1950_v43 = vld [vmem:[%s5102_s9 + $0x38] sm:$0xff] }
 0x71f   : > { %v1736_v53 = vmul.f32 %v4192_v52, %v4186_v36  ;;  %4005 = vmatprep.subr.bf16.mxu0 %v4281_v40  ;;  %v4782_v36 = vshrl.u32 %v1058_v47, 7  ;;  %v1949_v47 = vld [vmem:[%s5102_s9 + $0x30] sm:$0xff] }
 0x720   : > { %v4021_v52 = vpack.c.bf16 %v1950_v43, %v1949_v47 }
 0x721   : > { %3823 = vmatmul.mubr.msk.f32.vlgmr.msra.gmra.mrb[12].mxu0 %vm1148_vm6, %v1736_v53  ;;  %v1930_v37 = vsub.s32 0, %v4782_v36  ;;  %v1935_v41 = vsub.s32 1, %v4782_v36  ;;  %v3533_v53 = vld [vmem:[%s5101_s8 + $0x20] ss:$0 sm:$0xff] }
 0x722   : > { %3844 = vmatprep.mubr.msk.f32.mxu0 %vm4282_vm0, %v4283_v42  ;;  %4007 = vmatpush3.bf16.msra.mxu0 %v4006_v21 }
 0x723   : > { %4008 = vmatprep.subr.bf16.mxu0 %v4281_v40  ;;  %v1931_v44 = vrot.slane %v1912_v39, %v1930_v37  ;;  %v1936_v48 = vrot.slane %v1912_v39, %v1935_v41 }
 0x7ec   : > { %v1475_v60 = vpop.f32.mrb[8].mxu0 }
 0x7ed   : > { %1814 = vrot.lane.b32.xlu1 %v1475_v60, %s5118_s26  ;;  %v3804_v61 = vpop.f32.mrb[9].mxu0  ;;  %s5127_s26 = smov 80  }
 0x7f0   : > { %v1642_v62 = vpop.f32.mrb[10].mxu0 }
 0x7f1   : > { %1818 = vrot.lane.b32.xlu0 %v1642_v62, %s5117_s30  ;;  %v3814_v63 = vpop.f32.mrb[11].mxu0  ;;  %s5128_s30 = smov 72  }
 0x7f4   : > { %v1809_v0 = vpop.f32.mrb[12].mxu0 }
 0x7f5   : > { %1822 = vrot.lane.b32.xlu1 %v1809_v0, %s5116_s15  ;;  %v3824_v1 = vpop.f32.mrb[13].mxu0  ;;  %s5125_s15 = smov 120  }
 0x85f   : > { %v1815_v2 = vpop.permute.xlu1 %1814 }
 0x860   : > { %v1825_v4 = vsel %vm1148_vm6, %v4687_v5, %v1815_v2 }
 0x863   : > { %v1819_v3 = vpop.permute.xlu0 %1818 }
 0x864   : > { %v1827_v6 = vsel %vm1826_vm8, %v1825_v4, %v1819_v3 }
 0x867   : > { %v1823_v7 = vpop.permute.xlu1 %1822 }
 0x868   : > { %v1829_v8 = vsel %vm1828_vm9, %v1827_v6, %v1823_v7  ;;  %v3537_v6 = vld [vmem:[%s5098_s5 + $0x28] sm:$0xff]  ;;  %v3538_v7 = vld [vmem:[%s5098_s5 + $0x30] sm:$0xff] }
 0x869   : > { %3834 = vmatmul.mubr.msk.f32.vlgmr.msra.gmra.mrb[18].mxu1 %vm1071_vm5, %v1829_v8  ;;  %v4024_v8 = vpack.c.bf16 %v3538_v7, %v3537_v6 }
 0x86a   : > { %3863 = vmatprep.mubr.msk.f32.mxu1 %vm4282_vm0, %v4283_v42  ;;  %4013 = vmatpush3.bf16.msra.mxu1 %v4012_v27 }
 0x86b   : > { %4014 = vmatprep.subr.bf16.mxu1 %v4281_v40 }
 0x86e   : > { %4016 = vmatpush3.bf16.msra.mxu1 %v4015_v29 }
 0x86f   : > { %4017 = vmatprep.subr.bf16.mxu1 %v4281_v40 }
 0x872   : > { %4019 = vmatpush3.bf16.msra.mxu1 %v4018_v32 }
 0x873   : > { %4020 = vmatprep.subr.bf16.mxu1 %v4281_v40 }
 0x876   : > { %4022 = vmatpush3.bf16.msra.mxu1 %v4021_v52 }
 0x877   : > { %3887 = vmatprep.subr.mxu1 %v4283_v42 }
 0x93c   : > { %v1908_v10 = vpop.f32.mrb[18].mxu1 }
 0x93d   : > { %v1909_v11 = vadd.f32 %v3531_v9, %v1908_v10  ;;  %v3835_v12 = vpop.f32.mrb[19].mxu1  ;;  %v3539_v9 = vld [vmem:[%s5098_s5 + $0x38] sm:$0xff]  ;;  %v3540_v10 = vld [vmem:[%s5098_s5 + $0x40] sm:$0xff] }
 0x93f   : > { %v1913_v13 = vadd.f32 %v1909_v11, %v4628_v38  ;;  %v1940_v38 = vld [vmem:[%s5101_s8 + $0x10] sm:$0xff]  ;;  %v4027_v11 = vpack.c.bf16 %v3540_v10, %v3539_v9 }
 0x940   : > { %v4009_v23 = vpack.c.bf16 %v1941_v22, %v1940_v38  ;;  %v3542_v38 = vld [vmem:[%s5098_s5 + $0x48] ss:$0 sm:$0xff] }
 0x941   : > { %v1914_v5 = vsel %vm1071_vm5, %v1913_v13, 0.0 }
 0x942   : > { %1915 = vadd.xlane.f32.xlu0 %v1914_v5  ;;  %4010 = vmatpush3.bf16.msra.mxu0 %v4009_v23 }
 0x943   : > { %4023 = vmatprep.subr.bf16.mxu0 %v4281_v40 }
 0x9cf   : > { %v1916_v14 = vpop.xlane.xlu0 %1915 }
 0x9d0   : > { %v1918_v15 = vmul.f32 0.03125, %v1916_v14  ;;  %v2124_v14 = vsub.s32 2, %v4782_v36 }
 0x9d2   : > { %v1919_v16 = vsub.f32 %v1913_v13, %v1918_v15  ;;  %v2129_v15 = vsub.s32 3, %v4782_v36  ;;  %v3208_v36 = vld [vmem:[%s5104_s11 + $0x10] sm:$0xff] }
 0x9d4   : > { %v1920_v17 = vmul.f32 %v1919_v16, %v1919_v16  ;;  %v2130_v19 = vrot.slane %v1912_v39, %v2129_v15 }
 0x9d6   : > { %v1921_v18 = vsel %vm1071_vm5, %v1920_v17, 0.0 }
 0x9d7   : > { %1922 = vadd.xlane.f32.xlu1 %v1921_v18 }
 0xa64   : > { %v1923_v33 = vpop.xlane.xlu1 %1922 }
 0xa65   : > { %v1924_v34 = vmul.f32 0.03125, %v1923_v33 }
 0xa67   : > { %v1925_v35 = vadd.f32 1e-05, %v1924_v34 }
 0xa69   : > { %4193 = vrsqrt.f32 %v1925_v35 }
 0xa73   : > { %v4194_v45 = vpop.eup %4193 }
 0xa74   : > { %v1927_v46 = vmul.f32 %v4194_v45, %v1919_v16  ;;  %v2125_v16 = vrot.slane %v1912_v39, %v2124_v14 }
 0xa76   : > { %v1932_v49 = vmul.f32 %v1931_v44, %v1927_v46 }
 0xa78   : > { %v1937_v51 = vadd.f32 %v1936_v48, %v1932_v49 }
 0xa7a   : > { %3845 = vmatmul.mubr.msk.f32.vlgmr.msra.gmra.mrb[14].mxu0 %vm1071_vm5, %v1937_v51 }
 0xa7b   : > { %3874 = vmatprep.mubr.msk.f32.mxu0 %vm4282_vm0, %v4283_v42  ;;  %4025 = vmatpush3.bf16.msra.mxu0 %v4024_v8 }
 0xa7c   : > { %4026 = vmatprep.subr.bf16.mxu0 %v4281_v40 }
 0xa7f   : > { %4028 = vmatpush3.bf16.msra.mxu0 %v4027_v11 }
 0xa80   : > { %3877 = vmatprep.subr.mxu0 %v4283_v42 }
 0xb4d   : > { %v2025_v54 = vpop.f32.mrb[14].mxu0 }
 0xb4e   : > { %v2026_v55 = vadd.f32 %v3533_v53, %v2025_v54  ;;  %v3846_v56 = vpop.f32.mrb[15].mxu0 }
 0xb50   : > { %v2029_v57 = vmax.f32 %v2026_v55, 0.0 }
 0xb52   : > { %3864 = vmatmul.mubr.msk.f32.vlgmr.msra.gmra.mrb[20].mxu1 %vm2034_vm10, %v2029_v57 }
 0xb53   : > { %3889 = vmatprep.mubr.msk.f32.mxu1 %vm4282_vm0, %v4283_v42 }
 0xc25   : > { %v2104_v59 = vpop.f32.mrb[20].mxu1 }
 0xc26   : > { %v2105_v60 = vadd.f32 %v3535_v58, %v2104_v59  ;;  %v3865_v61 = vpop.f32.mrb[21].mxu1 }
 0xc28   : > { %v2108_v62 = vadd.f32 %v2105_v60, %v1937_v51 }
 0xc2a   : > { %v2109_v63 = vsel %vm1071_vm5, %v2108_v62, 0.0 }
 0xc2b   : > { %2110 = vadd.xlane.f32.xlu0 %v2109_v63 }
 0xcb8   : > { %v2111_v0 = vpop.xlane.xlu0 %2110 }
 0xcb9   : > { %v2112_v1 = vmul.f32 0.03125, %v2111_v0 }
 0xcbb   : > { %v2113_v2 = vsub.f32 %v2108_v62, %v2112_v1 }
 0xcbd   : > { %v2114_v3 = vmul.f32 %v2113_v2, %v2113_v2 }
 0xcbf   : > { %v2115_v4 = vsel %vm1071_vm5, %v2114_v3, 0.0 }
 0xcc0   : > { %2116 = vadd.xlane.f32.xlu0 %v2115_v4 }
 0xd4d   : > { %v2117_v12 = vpop.xlane.xlu0 %2116 }
 0xd4e   : > { %v2118_v13 = vmul.f32 0.03125, %v2117_v12 }
 0xd50   : > { %v2119_v5 = vadd.f32 1e-05, %v2118_v13 }
 0xd52   : > { %4195 = vrsqrt.f32 %v2119_v5 }
 0xd5c   : > { %v4196_v17 = vpop.eup %4195 }
 0xd5d   : > { %v2121_v18 = vmul.f32 %v4196_v17, %v2113_v2 }
 0xd5f   : > { %v2126_v20 = vmul.f32 %v2125_v16, %v2121_v18 }
 0xd61   : > { %v4834_v21 = vadd.f32 %v2130_v19, %v2126_v20 }
 0xd63   : > { %3875 = vmatmul.mubr.msk.f32.vlgmr.msra.gmra.mrb[16].mxu0 %vm1071_vm5, %v4834_v21 }
 0xd64   : > { %3879 = vmatprep.mubr.msk.f32.mxu0 %vm4282_vm0, %v4283_v42 }
 0xe36   : > { %v2211_v22 = vpop.f32.mrb[16].mxu0 }
 0xe37   : > { %v4843_v23 = vadd.f32 %v3542_v38, %v2211_v22  ;;  %v3876_v24 = vpop.f32.mrb[17].mxu0 }
 0xe39   : > { %2383 = vrot.lane.b32.xlu0 %v4843_v23, %s4291_s16  ;;  %2216 = vrot.lane.b32.xlu1 %v4843_v23, %s4285_s23  ;;  %s5129_s23 = smov 56   ;;  %s5131_s16 = smov 48  }
 0xe3d   : > { %2548 = vrot.lane.b32.xlu0 %v4843_v23, %s4289_s29  ;;  %2381 = vrot.lane.b32.xlu1 %v4843_v23, %s5125_s15  ;;  %s5130_s29 = smov 64   ;;  %s5133_s15 = smov 8  }
 0xe41   : > { %2715 = vrot.lane.b32.xlu0 %v4843_v23, %s5126_s17  ;;  %2550 = vrot.lane.b32.xlu1 %v4843_v23, %s5127_s26  ;;  %s3587_s17 = sshll.u32 %s4386_s25, 7  ;;  %s419_s26 = scalar_lea.vmem [#allocation2], %s3458_s27 }
 0xe42   : > { %s4299_s25 = smov [#allocation2]  }
 0xe43   : > { %s4221_s27 = sshll.u32 %s4299_s25, 4  ;;  %s4222_s27 = int_to_ptr.vmem [resolvable:$false] %s4221_s27 }
 0xe44   : > { %s4223_s18 = scalar_lea.vmem %s4222_s27, 256 }
 0xe45   : > { %2717 = vrot.lane.b32.xlu1 %v4843_v23, %s5128_s30  ;;  %s3383_s30 = sshll.u32 %s419_s26, 4  ;;  %s5053_s30 = int_to_ptr.vmem [resolvable:$true] %s3383_s30 }
 0xe46   : > { %s4217_s28 = scalar_lea.vmem %s5053_s30, 128  ;;  %p4224_p0 = scmp.lt.s32.totalorder %s5053_s30, %s4222_s27 }
 0xe47   : > { %p4218_p11 = scmp.ne.s32.totalorder %s5053_s30, %s4217_s28  ;;  %p4225_p1 = scmp.lt.s32.totalorder %s4223_s18, %s4217_s28 }
 0xe49   : > { %p4219_p12 = pnand %p4218_p11, %p4403_p5  ;;  %p4226_p2 = por %p4225_p1, %p4224_p0 }
 0xe4b   : > { %p4220_p13 = pneg %p4219_p12 }
 0xe4d   : > { %p4227_p3 = pnand %p4226_p2, %p4220_p13 }
 0xeab   : > { %v2384_v25 = vpop.permute.xlu0 %2383  ;;  %v2217_v26 = vpop.permute.xlu1 %2216 }
 0xeac   : > { %3878 = vmatpush3.xpose.msk.msra.mxu0 %vm1148_vm6, %v2217_v26  ;;  %3888 = vmatpush3.xpose.msk.msra.mxu1 %vm1148_vm6, %v2384_v25 }
 0xead   : > { %3897 = vmatprep.subr.mxu1 %v4283_v42  ;;  %3882 = vmatprep.subr.mxu0 %v4283_v42 }
 0xeaf   : > { %3880 = vmatmul.mubr.msk.f32.vlgmr.msra.gmra.mrb[18].mxu0 %vm1148_vm6, %v4843_v23  ;;  %v2382_v27 = vpop.permute.xlu1 %2381  ;;  %v2549_v29 = vpop.permute.xlu0 %2548 }
 0xeb0   : > { %3890 = vmatmul.mubr.msk.f32.vlgmr.msra.gmra.mrb[22].mxu1 %vm1148_vm6, %v2382_v27  ;;  %3884 = vmatprep.mubr.msk.f32.mxu0 %vm4282_vm0, %v4283_v42 }
 0xeb1   : > { %3899 = vmatprep.mubr.msk.f32.mxu1 %vm4282_vm0, %v4283_v42 }
 0xeb3   : > { %v2551_v28 = vpop.permute.xlu1 %2550  ;;  %v2716_v31 = vpop.permute.xlu0 %2715 }
 0xeb4   : > { %3898 = vmatpush3.xpose.msk.msra.mxu1 %vm1148_vm6, %v2551_v28 }
 0xeb5   : > { %3907 = vmatprep.subr.mxu1 %v4283_v42 }
 0xeb7   : > { %3900 = vmatmul.mubr.msk.f32.vlgmr.msra.gmra.mrb[24].mxu1 %vm1148_vm6, %v2549_v29  ;;  %v2718_v30 = vpop.permute.xlu1 %2717 }
 0xeb8   : > { %3908 = vmatpush3.xpose.msk.msra.mxu1 %vm1148_vm6, %v2718_v30  ;;  %3909 = vmatprep.mubr.msk.f32.mxu1 %vm4282_vm0, %v4283_v42 }
 0xeb9   : > { %4029 = vmatprep.subr.bf16.mxu1 %v4281_v40 }
 0xebb   : > { %3910 = vmatmul.mubr.msk.f32.vlgmr.msra.gmra.mrb[26].mxu1 %vm1148_vm6, %v2716_v31 }
 0xebc   : > { %3925 = vmatprep.mubr.msk.f32.mxu1 %vm4282_vm0, %v4283_v42 }
 0xf82   : > { %v2288_v32 = vpop.f32.mrb[18].mxu0 }
 0xf83   : > { %v2292_v33 = vmul.f32 0.35355338, %v2288_v32  ;;  %v3881_v34 = vpop.f32.mrb[19].mxu0  ;;  %v2455_v35 = vpop.f32.mrb[22].mxu1  ;;  %v3556_v32 = vld [vmem:[%s5099_s6 + $0x28] sm:$0xff] }
 0xf84   : > { %v2459_v39 = vmul.f32 0.35355338, %v2455_v35  ;;  %v3891_v44 = vpop.f32.mrb[23].mxu1 }
 0xf85   : > { %v2293_v45 = vadd.f32 %v2292_v33, %v4660_v50  ;;  %v3557_v33 = vld [vmem:[%s5099_s6 + $0x30] sm:$0xff] }
 0xf86   : > { %v2460_v46 = vadd.f32 %v2459_v39, %v4660_v50  ;;  %v4030_v34 = vpack.c.bf16 %v3557_v33, %v3556_v32 }
 0xf87   : > { %v2294_v48 = vsel %vm1148_vm6, %v2293_v45, -inf }
 0xf88   : > { %2295 = vmax.xlane.f32.xlu1 %v2294_v48  ;;  %v2461_v49 = vsel %vm1148_vm6, %v2460_v46, -inf  ;;  %4031 = vmatpush3.bf16.msra.mxu1 %v4030_v34  ;;  %v3559_v48 = vld [vmem:[%s5099_s6 + $0x40] sm:$0xff] }
 0xf89   : > { %2462 = vmax.xlane.f32.xlu0 %v2461_v49  ;;  %4032 = vmatprep.subr.bf16.mxu1 %v4281_v40 }
 0xf8a   : > { %v2622_v51 = vpop.f32.mrb[24].mxu1 }
 0xf8b   : > { %v2626_v47 = vmul.f32 0.35355338, %v2622_v51  ;;  %v3901_v43 = vpop.f32.mrb[25].mxu1 }
 0xf8d   : > { %v2627_v52 = vadd.f32 %v2626_v47, %v4660_v50 }
 0xf8e   : > { %v2789_v53 = vpop.f32.mrb[26].mxu1 }
 0xf8f   : > { %v2793_v54 = vmul.f32 0.35355338, %v2789_v53  ;;  %v3911_v55 = vpop.f32.mrb[27].mxu1  ;;  %v2628_v56 = vsel %vm1148_vm6, %v2627_v52, -inf }
 0xf90   : > { %2629 = vmax.xlane.f32.xlu0 %v2628_v56 }
 0xf91   : > { %v2794_v57 = vadd.f32 %v2793_v54, %v4660_v50 }
 0xf93   : > { %v2795_v58 = vsel %vm1148_vm6, %v2794_v57, -inf }
 0xf94   : > { %2796 = vmax.xlane.f32.xlu1 %v2795_v58 }
 0xfa5   : > { %2472 = vrot.lane.b32.xlu1 %v4843_v23, %s5129_s23 }
0x1015   : > { %v2296_v59 = vpop.xlane.xlu1 %2295 }
0x1016   : > { %v2297_v60 = vsub.f32 %v2293_v45, %v2296_v59  ;;  %v2463_v61 = vpop.xlane.xlu0 %2462  ;;  %v3561_v59 = vld [vmem:[%s5099_s6 + $0x48] ss:$0 sm:$0xff] }
0x1017   : > { %v2464_v62 = vsub.f32 %v2460_v46, %v2463_v61  ;;  %v3558_v46 = vld [vmem:[%s5099_s6 + $0x38] sm:$0xff] }
0x1018   : > { %v2298_v63 = vmul.f32 1.442695, %v2297_v60  ;;  %v4033_v49 = vpack.c.bf16 %v3559_v48, %v3558_v46 }
0x1019   : > { %v2465_v0 = vmul.f32 1.442695, %v2464_v62 }
0x101a   : > { %4197 = vpow2.f32 %v2298_v63  ;;  %4034 = vmatpush3.bf16.msra.mxu1 %v4033_v49 }
0x101b   : > { %4199 = vpow2.f32 %v2465_v0  ;;  %4041 = vmatprep.subr.bf16.mxu1 %v4281_v40 }
0x101d   : > { %v2630_v10 = vpop.xlane.xlu0 %2629 }
0x101e   : > { %v2631_v11 = vsub.f32 %v2627_v52, %v2630_v10 }
0x1020   : > { %v2632_v12 = vmul.f32 1.442695, %v2631_v11  ;;  %v3569_v11 = vld [vmem:[%s5102_s9 + $0x48] sm:$0xff] }
0x1021   : > { %v2797_v1 = vpop.xlane.xlu1 %2796 }
0x1022   : > { %v2798_v2 = vsub.f32 %v2794_v57, %v2797_v1 }
0x1024   : > { %v4198_v3 = vpop.eup %4197  ;;  %v2799_v4 = vmul.f32 1.442695, %v2798_v2 }
0x1025   : > { %v4200_v6 = vpop.eup %4199  ;;  %v2300_v50 = vsel %vm1148_vm6, %v4198_v3, 0.0  ;;  %v2473_v16 = vpop.permute.xlu1 %2472 }
0x1026   : > { %4201 = vpow2.f32 %v2799_v4  ;;  %2301 = vadd.xlane.f32.xlu0 %v2300_v50  ;;  %v2467_v7 = vsel %vm1148_vm6, %v4200_v6, 0.0  ;;  %v3564_v50 = vld [vmem:[%s5101_s8 + $0x28] sm:$0xff] }
0x1027   : > { %2468 = vadd.xlane.f32.xlu1 %v2467_v7  ;;  %4203 = vpow2.f32 %v2632_v12  ;;  %v3565_v7 = vld [vmem:[%s5101_s8 + $0x30] sm:$0xff] }
0x1028   : > { %v3570_v12 = vld [vmem:[%s5102_s9 + $0x50] sm:$0xff] }
0x1030   : > { %v4202_v8 = vpop.eup %4201 }
0x1031   : > { %v2801_v9 = vsel %vm1148_vm6, %v4202_v8, 0.0  ;;  %v4204_v13 = vpop.eup %4203 }
0x1032   : > { %2802 = vadd.xlane.f32.xlu1 %v2801_v9  ;;  %v2634_v5 = vsel %vm1148_vm6, %v4204_v13, 0.0  ;;  %v3567_v9 = vld [vmem:[%s5101_s8 + $0x40] sm:$0xff] }
0x103c   : > { %2305 = vrot.lane.b32.xlu0 %v4843_v23, %s5130_s29  ;;  %s5134_s29 = smov 16  }
0x1043   : > { %2639 = vrot.lane.b32.xlu1 %v4843_v23, %s5131_s16  ;;  %s5135_s16 = smov 24  }
0x105b   : > { %2635 = vadd.xlane.f32.xlu0 %v2634_v5  ;;  %v4042_v5 = vpack.c.bf16 %v3570_v12, %v3569_v11  ;;  %v3584_v12 = vld [vmem:[%s5104_s11 + $0x20] ss:$0 sm:$0xff] }
0x1071   : > { %2806 = vrot.lane.b32.xlu0 %v4843_v23, %s5132_s20  ;;  %s3370_s20 = scalar_lea.sflag [#allocation3], %s417_s19 }
0x10b3   : > { %v2302_v17 = vpop.xlane.xlu0 %2301 }
0x10b4   : > { %4205 = vrcp.f32 %v2302_v17  ;;  %v2469_v18 = vpop.xlane.xlu1 %2468 }
0x10b5   : > { %4207 = vrcp.f32 %v2469_v18  ;;  %v3573_v18 = vld [vmem:[%s5102_s9 + $0x68] sm:$0xff] }
0x10b7   : > { %v2306_v19 = vpop.permute.xlu0 %2305 }
0x10b8   : > { %3883 = vmatpush3.msra.mxu0 %v2306_v19  ;;  %v3574_v19 = vld [vmem:[%s5102_s9 + $0x70] sm:$0xff] }
0x10b9   : > { %3892 = vmatprep.subr.mxu0 %v4283_v42 }
0x10be   : > { %v4206_v20 = vpop.eup %4205 }
0x10bf   : > { %v2304_v38 = vmul.f32 %v4206_v20, %v4198_v3  ;;  %v2803_v22 = vpop.xlane.xlu1 %2802  ;;  %v4208_v24 = vpop.eup %4207  ;;  %v4048_v20 = vpack.c.bf16 %v3574_v19, %v3573_v18 }
0x10c0   : > { %v2471_v23 = vmul.f32 %v4208_v24, %v4200_v6 }
0x10c1   : > { %3885 = vmatmul.mubr.msk.f32.vlgmr.msra.gmra.mrb[20].mxu0 %vm1148_vm6, %v2304_v38 }
0x10c2   : > { %3893 = vmatpush3.msra.mxu0 %v2473_v16  ;;  %3894 = vmatprep.mubr.msk.f32.mxu0 %vm4282_vm0, %v4283_v42  ;;  %v3572_v16 = vld [vmem:[%s5102_s9 + $0x60] sm:$0xff] }
0x10c3   : > { %v2640_v25 = vpop.permute.xlu1 %2639  ;;  %3902 = vmatprep.subr.mxu0 %v4283_v42 }
0x10c5   : > { %3895 = vmatmul.mubr.msk.f32.vlgmr.msra.gmra.mrb[22].mxu0 %vm1148_vm6, %v2471_v23  ;;  %v3563_v23 = vld [vmem:[%s5100_s7 + $0x4] sm:$0xf] }
0x10c6   : > { %3903 = vmatpush3.msra.mxu0 %v2640_v25  ;;  %3904 = vmatprep.mubr.msk.f32.mxu0 %vm4282_vm0, %v4283_v42  ;;  %v2999_v25 = vrot.slane %v3563_v23, %v1930_v37  ;;  %v3576_v37 = vld [vmem:[%s5102_s9 + $0x80] sm:$0xff] }
0x10c7   : > { %3912 = vmatprep.subr.mxu0 %v4283_v42 }
0x10e8   : > { %v2636_v26 = vpop.xlane.xlu0 %2635 }
0x10e9   : > { %4209 = vrcp.f32 %v2636_v26 }
0x10ea   : > { %4211 = vrcp.f32 %v2803_v22 }
0x10ec   : > { %v2807_v30 = vpop.permute.xlu0 %2806 }
0x10f3   : > { %v4210_v27 = vpop.eup %4209 }
0x10f4   : > { %v2638_v28 = vmul.f32 %v4210_v27, %v4204_v13  ;;  %v4212_v29 = vpop.eup %4211  ;;  %v3571_v13 = vld [vmem:[%s5102_s9 + $0x58] sm:$0xff] }
0x10f5   : > { %v2805_v31 = vmul.f32 %v4212_v29, %v4202_v8  ;;  %v4036_v8 = vpack.c.bf16 %v3565_v7, %v3564_v50  ;;  %v4045_v17 = vpack.c.bf16 %v3572_v16, %v3571_v13 }
0x10f6   : > { %3905 = vmatmul.mubr.msk.f32.vlgmr.msra.gmra.mrb[24].mxu0 %vm1148_vm6, %v2638_v28  ;;  %v3004_v28 = vrot.slane %v3563_v23, %v1935_v41  ;;  %v3578_v41 = vld [vmem:[%s5101_s8 + $0x48] ss:$0 sm:$0xff] }
0x10f7   : > { %3913 = vmatpush3.msra.mxu0 %v2807_v30  ;;  %3914 = vmatprep.mubr.msk.f32.mxu0 %vm4282_vm0, %v4283_v42 }
0x10f8   : > { %4035 = vmatprep.subr.bf16.mxu0 %v4281_v40 }
0x10fa   : > { %3915 = vmatmul.mubr.msk.f32.vlgmr.msra.gmra.mrb[26].mxu0 %vm1148_vm6, %v2805_v31  ;;  %v3575_v31 = vld [vmem:[%s5102_s9 + $0x78] sm:$0xff] }
0x10fb   : > { %3936 = vmatprep.mubr.msk.f32.mxu0 %vm4282_vm0, %v4283_v42  ;;  %4037 = vmatpush3.bf16.msra.mxu0 %v4036_v8  ;;  %v4051_v32 = vpack.c.bf16 %v3576_v37, %v3575_v31 }
0x10fc   : > { %4038 = vmatprep.subr.bf16.mxu0 %v4281_v40 }
0x1194   : > { %v2377_v35 = vpop.f32.mrb[20].mxu0 }
0x1195   : > { %v3886_v39 = vpop.f32.mrb[21].mxu0 }
0x1198   : > { %v2544_v44 = vpop.f32.mrb[22].mxu0 }
0x1199   : > { %2883 = vrot.lane.b32.xlu1 %v2544_v44, %s5133_s15  ;;  %v3896_v45 = vpop.f32.mrb[23].mxu0  ;;  %v3580_v44 = vld [vmem:[%s5102_s9 + $0x88] ss:$0 sm:$0xff] }
0x11c9   : > { %v2711_v51 = vpop.f32.mrb[24].mxu0 }
0x11ca   : > { %2887 = vrot.lane.b32.xlu0 %v2711_v51, %s5134_s29  ;;  %v3906_v47 = vpop.f32.mrb[25].mxu0 }
0x11cd   : > { %v2878_v43 = vpop.f32.mrb[26].mxu0 }
0x11ce   : > { %2891 = vrot.lane.b32.xlu1 %v2878_v43, %s5135_s16  ;;  %v3916_v52 = vpop.f32.mrb[27].mxu0  ;;  %s5051_s16 = scalar_lea.hbm %s5105_s12, %s3587_s17 }
0x120b   : > { %v2884_v53 = vpop.permute.xlu1 %2883 }
0x120c   : > { %v2894_v55 = vsel %vm1148_vm6, %v2377_v35, %v2884_v53 }
0x123c   : > { %v2888_v54 = vpop.permute.xlu0 %2887 }
0x123d   : > { %v2895_v56 = vsel %vm1826_vm8, %v2894_v55, %v2888_v54  ;;  %v3201_v55 = vld [vmem:[%s5103_s10] sm:$0xff] }
0x1240   : > { %v2892_v57 = vpop.permute.xlu1 %2891 }
0x1241   : > { %v2896_v58 = vsel %vm1828_vm9, %v2895_v56, %v2892_v57  ;;  %v3202_v56 = vld [vmem:[%s5103_s10 + $0x8] sm:$0xff] }
0x1242   : > { %3926 = vmatmul.mubr.msk.f32.vlgmr.msra.gmra.mrb[28].mxu1 %vm1071_vm5, %v2896_v58  ;;  %v4054_v57 = vpack.c.bf16 %v3202_v56, %v3201_v55  ;;  %v3203_v58 = vld [vmem:[%s5103_s10 + $0x10] sm:$0xff] }
0x1243   : > { %3955 = vmatprep.mubr.msk.f32.mxu1 %vm4282_vm0, %v4283_v42  ;;  %4043 = vmatpush3.bf16.msra.mxu1 %v4042_v5 }
0x1244   : > { %4044 = vmatprep.subr.bf16.mxu1 %v4281_v40 }
0x1247   : > { %4046 = vmatpush3.bf16.msra.mxu1 %v4045_v17 }
0x1248   : > { %4047 = vmatprep.subr.bf16.mxu1 %v4281_v40 }
0x124b   : > { %4049 = vmatpush3.bf16.msra.mxu1 %v4048_v20 }
0x124c   : > { %4050 = vmatprep.subr.bf16.mxu1 %v4281_v40 }
0x124f   : > { %4052 = vmatpush3.bf16.msra.mxu1 %v4051_v32 }
0x1315   : > { %v2976_v60 = vpop.f32.mrb[28].mxu1 }
0x1316   : > { %v2977_v61 = vadd.f32 %v3561_v59, %v2976_v60  ;;  %v3927_v62 = vpop.f32.mrb[29].mxu1  ;;  %v3204_v59 = vld [vmem:[%s5103_s10 + $0x18] sm:$0xff] }
0x1317   : > { %v4057_v60 = vpack.c.bf16 %v3204_v59, %v3203_v58 }
0x1318   : > { %v2982_v63 = vadd.f32 %v2977_v61, %v4834_v21  ;;  %v3566_v21 = vld [vmem:[%s5101_s8 + $0x38] sm:$0xff] }
0x1319   : > { %v4039_v10 = vpack.c.bf16 %v3567_v9, %v3566_v21  ;;  %v3582_v21 = vld [vmem:[%s5103_s10 + $0x20] ss:$0 sm:$0xff] }
0x131a   : > { %v2983_v0 = vsel %vm1071_vm5, %v2982_v63, 0.0 }
0x131b   : > { %2984 = vadd.xlane.f32.xlu0 %v2983_v0  ;;  %4040 = vmatpush3.bf16.msra.mxu0 %v4039_v10  ;;  %v3194_v0 = vrot.slane %v3563_v23, %v2124_v14  ;;  %v3209_v14 = vld [vmem:[%s5104_s11 + $0x18] sm:$0xff] }
0x131c   : > { %4053 = vmatprep.subr.bf16.mxu0 %v4281_v40 }
0x13a8   : > { %v2985_v1 = vpop.xlane.xlu0 %2984 }
0x13a9   : > { %v2986_v2 = vmul.f32 0.03125, %v2985_v1 }
0x13ab   : > { %v2987_v3 = vsub.f32 %v2982_v63, %v2986_v2 }
0x13ad   : > { %v2988_v4 = vmul.f32 %v2987_v3, %v2987_v3 }
0x13af   : > { %v2989_v6 = vsel %vm1071_vm5, %v2988_v4, 0.0  ;;  %v3206_v4 = vld [vmem:[%s5104_s11] sm:$0xff] }
0x13b0   : > { %2990 = vadd.xlane.f32.xlu1 %v2989_v6  ;;  %v3207_v6 = vld [vmem:[%s5104_s11 + $0x8] sm:$0xff] }
0x13b1   : > { %v4060_v7 = vpack.c.bf16 %v3207_v6, %v3206_v4 }
0x143d   : > { %v2991_v38 = vpop.xlane.xlu1 %2990 }
0x143e   : > { %v2992_v22 = vmul.f32 0.03125, %v2991_v38 }
0x1440   : > { %v2993_v24 = vadd.f32 1e-05, %v2992_v22 }
0x1442   : > { %4213 = vrsqrt.f32 %v2993_v24 }
0x144c   : > { %v4214_v26 = vpop.eup %4213 }
0x144d   : > { %v2995_v27 = vmul.f32 %v4214_v26, %v2987_v3  ;;  %v3199_v3 = vrot.slane %v3563_v23, %v2129_v15  ;;  %v4063_v15 = vpack.c.bf16 %v3209_v14, %v3208_v36 }
0x144f   : > { %v3000_v29 = vmul.f32 %v2999_v25, %v2995_v27 }
0x1451   : > { %v3005_v30 = vadd.f32 %v3004_v28, %v3000_v29 }
0x1453   : > { %3937 = vmatmul.mubr.msk.f32.vlgmr.msra.gmra.mrb[28].mxu0 %vm1071_vm5, %v3005_v30 }
0x1454   : > { %3966 = vmatprep.mubr.msk.f32.mxu0 %vm4282_vm0, %v4283_v42  ;;  %4055 = vmatpush3.bf16.msra.mxu0 %v4054_v57 }
0x1455   : > { %4056 = vmatprep.subr.bf16.mxu0 %v4281_v40 }
0x1458   : > { %4058 = vmatpush3.bf16.msra.mxu0 %v4057_v60 }
0x1459   : > { %4059 = vmatprep.subr.bf16.mxu0 %v4281_v40 }
0x1526   : > { %v3095_v33 = vpop.f32.mrb[28].mxu0 }
0x1527   : > { %v3096_v34 = vadd.f32 %v3578_v41, %v3095_v33  ;;  %v3938_v35 = vpop.f32.mrb[29].mxu0 }
0x1529   : > { %v3099_v39 = vmax.f32 %v3096_v34, 0.0 }
0x152b   : > { %3956 = vmatmul.mubr.msk.f32.vlgmr.msra.gmra.mrb[30].mxu1 %vm2034_vm10, %v3099_v39 }
0x15fe   : > { %v3173_v45 = vpop.f32.mrb[30].mxu1 }
0x15ff   : > { %v3174_v46 = vadd.f32 %v3580_v44, %v3173_v45  ;;  %v3957_v48 = vpop.f32.mrb[31].mxu1 }
0x1601   : > { %v3177_v49 = vadd.f32 %v3174_v46, %v3005_v30 }
0x1603   : > { %v3178_v51 = vsel %vm1071_vm5, %v3177_v49, 0.0 }
0x1604   : > { %3179 = vadd.xlane.f32.xlu0 %v3178_v51 }
0x1691   : > { %v3180_v47 = vpop.xlane.xlu0 %3179 }
0x1692   : > { %v3181_v43 = vmul.f32 0.03125, %v3180_v47 }
0x1694   : > { %v3182_v52 = vsub.f32 %v3177_v49, %v3181_v43 }
0x1696   : > { %v3183_v53 = vmul.f32 %v3182_v52, %v3182_v52 }
0x1698   : > { %v3184_v54 = vsel %vm1071_vm5, %v3183_v53, 0.0 }
0x1699   : > { %3185 = vadd.xlane.f32.xlu0 %v3184_v54 }
0x1726   : > { %v3186_v61 = vpop.xlane.xlu0 %3185 }
0x1727   : > { %v3187_v62 = vmul.f32 0.03125, %v3186_v61 }
0x1729   : > { %v3188_v63 = vadd.f32 1e-05, %v3187_v62 }
0x172b   : > { %4215 = vrsqrt.f32 %v3188_v63 }
0x1735   : > { %v4216_v1 = vpop.eup %4215 }
0x1736   : > { %v3190_v2 = vmul.f32 %v4216_v1, %v3182_v52 }
0x1738   : > { %v3195_v50 = vmul.f32 %v3194_v0, %v3190_v2 }
0x173a   : > { %v3200_v8 = vadd.f32 %v3199_v3, %v3195_v50 }
0x173c   : > { %3967 = vmatmul.mubr.msk.f32.vlgmr.msra.gmra.mrb[30].mxu0 %vm1071_vm5, %v3200_v8 }
0x173d   : > { %4061 = vmatpush3.bf16.msra.mxu0 %v4060_v7  ;;  %3977 = vmatprep.mubr.msk.f32.mxu0 %vm4282_vm0, %v4283_v42 }
0x173e   : > { %4062 = vmatprep.subr.bf16.mxu0 %v4281_v40 }
0x1741   : > { %4064 = vmatpush3.bf16.msra.mxu0 %v4063_v15 }
0x180f   : > { %v3284_v9 = vpop.f32.mrb[30].mxu0 }
0x1810   : > { %v3285_v10 = vadd.f32 %v3582_v21, %v3284_v9  ;;  %v3968_v42 = vpop.f32.mrb[31].mxu0 }
0x1812   : > { %vm3288_vm11 = vcmp.gt.f32.partialorder %v3285_v10, 0.0  ;;  %v3289_v40 = vmul.f32 0.1, %v3285_v10 }
0x1814   : > { %v3290_v11 = vsel %vm3288_vm11, %v3285_v10, %v3289_v40 }
0x1815   : > { %3978 = vmatmul.mubr.msk.f32.vlgmr.msra.gmra.mrb[32].mxu0 %vm1071_vm5, %v3290_v11 }
0x18e8   : > { %v3364_v13 = vpop.f32.mrb[32].mxu0 }
0x18e9   : > { %v3365_v5 = vadd.f32 %v3584_v12, %v3364_v13  ;;  %v3979_v16 = vpop.f32.mrb[33].mxu0 }
0x18eb   : > { %3368 = vst [vmem:[%s419_s26] sm:$0xff] %v3365_v5 }
0x18ec   : > { %4230 = shalt.err (!%p4227_p3)
}
0x18ed   : > { %s4231_s19 = scalar_lea.hbm %s5051_s16, 128  ;;  %s4235_s26 = scalar_lea.hbm %s5105_s12, 256 }
0x18ee   : > { %p4232_p4 = scmp.ne.s32.totalorder %s5051_s16, %s4231_s19  ;;  %p4236_p9 = scmp.lt.u32.totalorder %s5051_s16, %s5105_s12 }
0x18ef   : > { %p4237_p10 = scmp.lt.u32.totalorder %s4235_s26, %s4231_s19  ;;  %p4239_p12 = scmp.lt.u32.totalorder %s4231_s19, %s5051_s16 }
0x18f0   : > { %p4233_p7 = pnand %p4232_p4, %p4403_p5 }
0x18f1   : > { %p4238_p11 = por %p4237_p10, %p4236_p9 }
0x18f2   : > { %p4234_p8 = pneg %p4233_p7 }
0x18f3   : > { %p4240_p13 = por %p4239_p12, %p4238_p11 }
0x18f5   : > { %p4241_p0 = pnand %p4240_p13, %p4234_p8 }
0x18f7   : > { %4244 = shalt.err (!%p4241_p0)
}
0x18f8   : > { %4066 = dma.vmem_to_hbm [thread:$0]  (%p4403_p5), %s5053_s30, 128, %s5051_s16, %s3370_s20  }
0x18f9 PF: > { %p4072_p1 = scmp.ge.s32.totalorder %s4279_s24, 2  ;;  %s3395_s28 = sand.u32 1, %s4267_s21  }
0x18fa   : > { %s3396_s25 = scalar_lea.sflag [#allocation3], %s3395_s28 }
0x18fb   : > { %p4069_p2 = pnand %p4072_p1, %p4407_p6 }
0x18fd   : > { %4262 = dma.done.wait (!%p4069_p2), %s3396_s25, 128  }
0x18fe   : > { %4264 = vsyncadd (!%p4069_p2), %s3396_s25, 4294967168  ;;  %s5136_s24 = sld [smem:[#allocation6_spill]]  ;;  %s5137_s27 = sld [smem:[#allocation5_spill]] }
0x18ff   : > { %s5138_s23 = sld [smem:[#allocation7_spill]]  ;;  %s5139_s21 = smov %s4271_s22 }
0x1904   : > { %p22_p3 = scmp.ge.s32.totalorder %s5136_s24, 4   ;;  %s5140_s22 = smov %s5137_s27 }
0x1906   :  { %24 = sbr.rel (!%p22_p3) target bundleno = 3 (0x3), region = 111 }
0x190d   :  { %3401 = vsyncpa [#allocation3], 1 }
0x190e   :  { %3403 = vsyncpa [#allocation3 + $0x1], 1 }

</bundles_post_ra>
